<compile_context>
chip_gen: v6e
topology: v6e:2x2x1
jax: 0.10.0
libtpu: 0.0.40
codegen_flags: <defaults>
</compile_context>

<pallas_src>
import functools

import jax
import jax.numpy as jnp
from jax.experimental import pallas as pl
from jax.experimental.pallas import tpu as pltpu


def _round_up(n, m):
    return (n + m - 1) // m * m


def classifier_kernel(x_ref, w1, b1, w2, b2, w3, b3, out_ref, *, nct):
    """Fused Linear->ReLU->Linear->ReLU->Linear->Softmax on one batch tile."""
    h = x_ref[...].astype(jnp.bfloat16)  # [tile_b, nfeature]

    # Layer 1: bf16 MXU inputs, f32 accumulate; bias-add / ReLU in f32.
    h = jnp.dot(h, w1[...], preferred_element_type=jnp.float32) + b1[...]
    h = jnp.maximum(h, 0.0)

    # Layer 2
    h = jnp.dot(h.astype(jnp.bfloat16), w2[...],
                preferred_element_type=jnp.float32) + b2[...]
    h = jnp.maximum(h, 0.0)

    # Layer 3 -> logits (zero-padded to 128 class lanes)
    logits = jnp.dot(h.astype(jnp.bfloat16), w3[...],
                     preferred_element_type=jnp.float32) + b3[...]

    # Mask the padded class lanes so they never contribute to the softmax.
    col = jax.lax.broadcasted_iota(jnp.int32, logits.shape, 1)
    logits = jnp.where(col < nct, logits, jnp.float32(-1e30))

    # Row-wise numerically-stable softmax; exact division keeps rows
    # normalized to f32 precision before the bf16 store (DMA-bound kernel,
    # so the divide is free).
    m = jnp.max(logits, axis=-1, keepdims=True)
    e = jnp.exp(logits - m)
    s = jnp.sum(e, axis=-1, keepdims=True)
    out_ref[...] = (e / s).astype(out_ref.dtype)


def prepare_params(params, nfeature, nct):
    """Pad output (lane) dims to multiples of 128; cast weights to bf16.

    Contraction (input) dims are left unpadded: a BlockSpec block spanning
    the full array dim is always legal and Mosaic masks non-128 contractions
    internally, so x never needs a feature-padding materialization pass.
    """
    (w1, b1), (w2, b2), (w3, b3) = params
    h1_pad = _round_up(w1.shape[1], 128)   # 100 -> 128
    h2_pad = _round_up(w2.shape[1], 128)   # 50  -> 128
    nct_pad = _round_up(nct, 128)          # nct -> 128

    def pad_w(w, r, c):
        out = jnp.zeros((r, c), jnp.float32)
        return out.at[:w.shape[0], :w.shape[1]].set(w).astype(jnp.bfloat16)

    def pad_b(b, c):
        out = jnp.zeros((1, c), jnp.float32)
        return out.at[:, :b.shape[-1]].set(b.reshape(1, -1))

    flat = (pad_w(w1, nfeature, h1_pad), pad_b(b1, h1_pad),
            pad_w(w2, h1_pad, h2_pad), pad_b(b2, h2_pad),
            pad_w(w3, h2_pad, nct_pad), pad_b(b3, nct_pad))
    return flat, nct_pad


def _choose_batch_tiling(B, nfeature, nct_pad):
    """Pick (tile_b, B_pad, n_tiles).

    - tile_b is a multiple of 16 (bf16 output sublane packing).
    - Prefer an even grid of 2 tiles: both v7x TensorCores get work; the
      single TC on v5e/v6e pays at most two grid-step overheads.
    - Grow the grid (in even steps) only when the double-buffered x / out
      blocks would exceed the VMEM budget (matters for very large nfeature,
      especially on v7x's 64 MiB VMEM).
    """
    SUB = 16
    B_min = _round_up(B, SUB)
    budget = 20 << 20                                    # pipelined-block budget
    bytes_per_row = nfeature * 4 * 2 + nct_pad * 2 * 2   # x f32 + out bf16, double-buffered
    max_rows = max(SUB, (budget // bytes_per_row) // SUB * SUB)
    n_tiles = 1 if B_min <= SUB else 2
    while True:
        tile_b = _round_up(pl.cdiv(B_min, n_tiles), SUB)
        if tile_b <= max_rows:
            break
        n_tiles += 2
    return tile_b, tile_b * n_tiles, n_tiles


def normal_classifier_forward(x, params, nct):
    """x: [B, nfeature] (f32 or bf16).  params: [(W1,b1),(W2,b2),(W3,b3)] unpadded.

    Returns softmax probabilities as bf16 [B, nct]; cast in the consumer if
    f32 is required (bf16 halves the dominant output writeback DMA).
    """
    B, nfeature = x.shape
    flat_params, nct_pad = prepare_params(params, nfeature, nct)
    tile_b, B_pad, n_tiles = _choose_batch_tiling(B, nfeature, nct_pad)

    # Pad only tail batch rows (no feature padding, no full re-materialization
    # when B is already tile-aligned).
    if B_pad != B:
        x = jnp.pad(x, ((0, B_pad - B), (0, 0)))

    # Weights/biases: block == full array + constant index_map -> DMA'd once,
    # VMEM-resident across the whole grid.  Single-buffer them only when the
    # second buffer would actually cost meaningful VMEM (large nfeature).
    resident_bytes = sum(int(t.size) * t.dtype.itemsize for t in flat_params)
    const_map = lambda i: (0, 0)
    in_specs = [pl.BlockSpec((tile_b, nfeature), lambda i: (i, 0))]
    for t in flat_params:
        if resident_bytes > (4 << 20):
            in_specs.append(pl.BlockSpec(t.shape, const_map,
                                         pipeline_mode=pl.Buffered(1)))
        else:
            in_specs.append(pl.BlockSpec(t.shape, const_map))

    flops = 2 * B_pad * sum(int(w.shape[0]) * int(w.shape[1])
                            for w in flat_params[::2])
    transcendentals = B_pad * nct_pad                      # exp in softmax
    bytes_accessed = (int(x.size) * x.dtype.itemsize       # x read
                      + B_pad * nct_pad * 2                # bf16 writeback
                      + resident_bytes)                    # weights, once

    out = pl.pallas_call(
        functools.partial(classifier_kernel, nct=nct),
        out_shape=jax.ShapeDtypeStruct((B_pad, nct_pad), jnp.bfloat16),
        grid=(n_tiles,),
        in_specs=in_specs,
        out_specs=pl.BlockSpec((tile_b, nct_pad), lambda i: (i, 0)),
        compiler_params=pltpu.CompilerParams(
            dimension_semantics=("parallel",),
            vmem_limit_bytes=32 * 1024 * 1024),
        cost_estimate=pl.CostEstimate(
            flops=int(flops),
            transcendentals=int(transcendentals),
            bytes_accessed=int(bytes_accessed)),
    )(x, *flat_params)

    # Strip batch and class padding; keep bf16 (consumer casts if needed).
    return out[:B, :nct]


def init_params(key, nfeature, nct):
    """PyTorch-Linear-style init for the 3 classifier layers (unpadded)."""
    dims = [(nfeature, 100), (100, 50), (50, nct)]
    params = []
    for (din, dout) in dims:
        key, kw, kb = jax.random.split(key, 3)
        scale = 1.0 / jnp.sqrt(jnp.float32(din))
        w = jax.random.uniform(kw, (din, dout), jnp.float32, -scale, scale)
        b = jax.random.uniform(kb, (dout,), jnp.float32, -scale, scale)
        params.append((w, b))
    return params


def reference_forward(x, params):
    (w1, b1), (w2, b2), (w3, b3) = params
    hp = jax.lax.Precision.HIGHEST
    h = jnp.maximum(jnp.dot(x, w1, precision=hp) + b1, 0.0)
    h = jnp.maximum(jnp.dot(h, w2, precision=hp) + b2, 0.0)
    logits = jnp.dot(h, w3, precision=hp) + b3
    return jax.nn.softmax(logits, axis=1)


if __name__ == "__main__":
    B, nfeature, nct = 512, 128, 16   # grid = 2 tiles of 256 rows

    key = jax.random.PRNGKey(0)
    key, kx = jax.random.split(key)
    x = jax.random.normal(kx, (B, nfeature), jnp.float32)
    params = init_params(key, nfeature, nct)

    out = normal_classifier_forward(x, params, nct)
    out = jax.block_until_ready(out)

    ref = reference_forward(x, params)
    assert out.shape == (B, nct) and out.dtype == jnp.bfloat16
    out_f32 = out.astype(jnp.float32)
    # bf16 MXU inputs + bf16 output -> small numerical difference vs f32 ref.
    assert jnp.allclose(out_f32, ref, atol=2e-2, rtol=2e-2)
    # softmax rows sum to ~1 (exact division; bf16 store rounding only)
    assert jnp.allclose(out_f32.sum(axis=1), 1.0, atol=1e-2)

    print("KERNEL_OK")
</pallas_src>

<mosaic_0001>
module attributes {stable_mosaic.version = 11 : i64} {
  func.func @classifier_kernel(%arg0: i32, %arg1: memref<256x128xf32, #tpu.memory_space<vmem>>, %arg2: memref<128x128xbf16, #tpu.memory_space<vmem>>, %arg3: memref<1x128xf32, #tpu.memory_space<vmem>>, %arg4: memref<128x128xbf16, #tpu.memory_space<vmem>>, %arg5: memref<1x128xf32, #tpu.memory_space<vmem>>, %arg6: memref<128x128xbf16, #tpu.memory_space<vmem>>, %arg7: memref<1x128xf32, #tpu.memory_space<vmem>>, %arg8: memref<256x128xbf16, #tpu.memory_space<vmem>>) attributes {dimension_semantics = [#tpu.dimension_semantics<parallel>], iteration_bounds = array<i64: 2>, scalar_prefetch = 0 : i64, scratch_operands = 0 : i64, tpu.core_type = #tpu.core_type<tc>, window_params = [{transform_indices = @transform_0, window_bounds = array<i64: 256, 128>}, {pipeline_mode = #tpu.pipeline_mode<synchronous>, transform_indices = @transform_1, window_bounds = array<i64: 128, 128>}, {pipeline_mode = #tpu.pipeline_mode<synchronous>, transform_indices = @transform_2, window_bounds = array<i64: 1, 128>}, {pipeline_mode = #tpu.pipeline_mode<synchronous>, transform_indices = @transform_3, window_bounds = array<i64: 128, 128>}, {pipeline_mode = #tpu.pipeline_mode<synchronous>, transform_indices = @transform_4, window_bounds = array<i64: 1, 128>}, {pipeline_mode = #tpu.pipeline_mode<synchronous>, transform_indices = @transform_5, window_bounds = array<i64: 128, 128>}, {pipeline_mode = #tpu.pipeline_mode<synchronous>, transform_indices = @transform_6, window_bounds = array<i64: 1, 128>}, {transform_indices = @transform_7, window_bounds = array<i64: 256, 128>}]} {
    %c0 = arith.constant 0 : index
    %c0_0 = arith.constant 0 : index
    %0 = vector.load %arg1[%c0, %c0_0] : memref<256x128xf32, #tpu.memory_space<vmem>>, vector<256x128xf32>
    %1 = arith.truncf %0 : vector<256x128xf32> to vector<256x128xbf16>
    %c0_1 = arith.constant 0 : index
    %c0_2 = arith.constant 0 : index
    %2 = vector.load %arg2[%c0_1, %c0_2] : memref<128x128xbf16, #tpu.memory_space<vmem>>, vector<128x128xbf16>
    %cst = arith.constant dense<0.000000e+00> : vector<256x128xf32>
    %3 = tpu.matmul %1, %2, %cst {dimension_numbers = #tpu.dot_dimension_numbers<[1], [0], [0], [1], [0, 0, 1, 1], [], []>} : vector<256x128xbf16>, vector<128x128xbf16>, vector<256x128xf32> -> vector<256x128xf32>
    %c0_3 = arith.constant 0 : index
    %c0_4 = arith.constant 0 : index
    %4 = vector.load %arg3[%c0_3, %c0_4] : memref<1x128xf32, #tpu.memory_space<vmem>>, vector<1x128xf32>
    %5 = vector.broadcast %4 : vector<1x128xf32> to vector<256x128xf32>
    %6 = arith.addf %3, %5 : vector<256x128xf32>
    %cst_5 = arith.constant 0.000000e+00 : f32
    %7 = vector.broadcast %cst_5 : f32 to vector<256x128xf32>
    %8 = arith.maximumf %6, %7 : vector<256x128xf32>
    %9 = arith.truncf %8 : vector<256x128xf32> to vector<256x128xbf16>
    %c0_6 = arith.constant 0 : index
    %c0_7 = arith.constant 0 : index
    %10 = vector.load %arg4[%c0_6, %c0_7] : memref<128x128xbf16, #tpu.memory_space<vmem>>, vector<128x128xbf16>
    %cst_8 = arith.constant dense<0.000000e+00> : vector<256x128xf32>
    %11 = tpu.matmul %9, %10, %cst_8 {dimension_numbers = #tpu.dot_dimension_numbers<[1], [0], [0], [1], [0, 0, 1, 1], [], []>} : vector<256x128xbf16>, vector<128x128xbf16>, vector<256x128xf32> -> vector<256x128xf32>
    %c0_9 = arith.constant 0 : index
    %c0_10 = arith.constant 0 : index
    %12 = vector.load %arg5[%c0_9, %c0_10] : memref<1x128xf32, #tpu.memory_space<vmem>>, vector<1x128xf32>
    %13 = vector.broadcast %12 : vector<1x128xf32> to vector<256x128xf32>
    %14 = arith.addf %11, %13 : vector<256x128xf32>
    %cst_11 = arith.constant 0.000000e+00 : f32
    %15 = vector.broadcast %cst_11 : f32 to vector<256x128xf32>
    %16 = arith.maximumf %14, %15 : vector<256x128xf32>
    %17 = arith.truncf %16 : vector<256x128xf32> to vector<256x128xbf16>
    %c0_12 = arith.constant 0 : index
    %c0_13 = arith.constant 0 : index
    %18 = vector.load %arg6[%c0_12, %c0_13] : memref<128x128xbf16, #tpu.memory_space<vmem>>, vector<128x128xbf16>
    %cst_14 = arith.constant dense<0.000000e+00> : vector<256x128xf32>
    %19 = tpu.matmul %17, %18, %cst_14 {dimension_numbers = #tpu.dot_dimension_numbers<[1], [0], [0], [1], [0, 0, 1, 1], [], []>} : vector<256x128xbf16>, vector<128x128xbf16>, vector<256x128xf32> -> vector<256x128xf32>
    %c0_15 = arith.constant 0 : index
    %c0_16 = arith.constant 0 : index
    %20 = vector.load %arg7[%c0_15, %c0_16] : memref<1x128xf32, #tpu.memory_space<vmem>>, vector<1x128xf32>
    %21 = vector.broadcast %20 : vector<1x128xf32> to vector<256x128xf32>
    %22 = arith.addf %19, %21 : vector<256x128xf32>
    %23 = tpu.iota {dimensions = array<i32: 1>} : vector<256x128xi32>
    %c16_i32 = arith.constant 16 : i32
    %24 = vector.broadcast %c16_i32 : i32 to vector<256x128xi32>
    %25 = arith.cmpi slt, %23, %24 : vector<256x128xi32>
    %cst_17 = arith.constant -1.000000e+30 : f32
    %26 = vector.broadcast %cst_17 : f32 to vector<256x128xf32>
    %27 = arith.select %25, %22, %26 : vector<256x128xi1>, vector<256x128xf32>
    %cst_18 = arith.constant dense<0xFF800000> : vector<256xf32>
    %28 = vector.multi_reduction <maximumf>, %27, %cst_18 [1] : vector<256x128xf32> to vector<256xf32>
    %29 = vector.shape_cast %28 : vector<256xf32> to vector<256x1xf32>
    %30 = vector.broadcast %29 : vector<256x1xf32> to vector<256x128xf32>
    %31 = arith.subf %27, %30 : vector<256x128xf32>
    %32 = math.exp %31 : vector<256x128xf32>
    %cst_19 = arith.constant dense<0.000000e+00> : vector<256xf32>
    %33 = vector.multi_reduction <add>, %32, %cst_19 [1] : vector<256x128xf32> to vector<256xf32>
    %34 = vector.shape_cast %33 : vector<256xf32> to vector<256x1xf32>
    %35 = vector.broadcast %34 : vector<256x1xf32> to vector<256x128xf32>
    %36 = arith.divf %32, %35 : vector<256x128xf32>
    %37 = arith.truncf %36 : vector<256x128xf32> to vector<256x128xbf16>
    %c0_20 = arith.constant 0 : index
    %c0_21 = arith.constant 0 : index
    %38 = vector.load %arg8[%c0_20, %c0_21] : memref<256x128xbf16, #tpu.memory_space<vmem>>, vector<256x128xbf16>
    tpu.vector_store %arg8[%c0_20, %c0_21], %37 {strides = array<i32>} : memref<256x128xbf16, #tpu.memory_space<vmem>>, vector<256x128xbf16>,
    return
  }
  func.func @transform_0(%arg0: i32) -> (i32, i32) {
    %c0_i32 = arith.constant 0 : i32
    %c0_i32_0 = arith.constant 0 : i32
    return %arg0, %c0_i32 : i32, i32
  }
  func.func @transform_1(%arg0: i32) -> (i32, i32) {
    %c0_i32 = arith.constant 0 : i32
    %c0_i32_0 = arith.constant 0 : i32
    %c0_i32_1 = arith.constant 0 : i32
    return %c0_i32, %c0_i32_0 : i32, i32
  }
  func.func @transform_2(%arg0: i32) -> (i32, i32) {
    %c0_i32 = arith.constant 0 : i32
    %c0_i32_0 = arith.constant 0 : i32
    %c0_i32_1 = arith.constant 0 : i32
    return %c0_i32, %c0_i32_0 : i32, i32
  }
  func.func @transform_3(%arg0: i32) -> (i32, i32) {
    %c0_i32 = arith.constant 0 : i32
    %c0_i32_0 = arith.constant 0 : i32
    %c0_i32_1 = arith.constant 0 : i32
    return %c0_i32, %c0_i32_0 : i32, i32
  }
  func.func @transform_4(%arg0: i32) -> (i32, i32) {
    %c0_i32 = arith.constant 0 : i32
    %c0_i32_0 = arith.constant 0 : i32
    %c0_i32_1 = arith.constant 0 : i32
    return %c0_i32, %c0_i32_0 : i32, i32
  }
  func.func @transform_5(%arg0: i32) -> (i32, i32) {
    %c0_i32 = arith.constant 0 : i32
    %c0_i32_0 = arith.constant 0 : i32
    %c0_i32_1 = arith.constant 0 : i32
    return %c0_i32, %c0_i32_0 : i32, i32
  }
  func.func @transform_6(%arg0: i32) -> (i32, i32) {
    %c0_i32 = arith.constant 0 : i32
    %c0_i32_0 = arith.constant 0 : i32
    %c0_i32_1 = arith.constant 0 : i32
    return %c0_i32, %c0_i32_0 : i32, i32
  }
  func.func @transform_7(%arg0: i32) -> (i32, i32) {
    %c0_i32 = arith.constant 0 : i32
    %c0_i32_0 = arith.constant 0 : i32
    return %arg0, %c0_i32 : i32, i32
  }
}

</mosaic_0001>

<bundles_post_ra>
// kernel: tpu_custom_call.1
= control target key start
LH: loop header
LB: loop body
LE: loop exit
PB: predicated region body
PF: predicated region fallthrough
CT: control target
= control target key end

     0   :  { %s3392_s0 = inlined_call_operand.hbm [shape: f32[512,128], index: 0, kind: input, shape index: {}]   ;;  %s3393_s1 = inlined_call_operand.hbm [shape: bf16[128,128], index: 1, kind: input, shape index: {}]   ;;  %s3394_s2 = inlined_call_operand.vmem [shape: f32[1,128], index: 2, kind: input, shape index: {}]   ;;  %s3395_s3 = inlined_call_operand.hbm [shape: bf16[128,128], index: 3, kind: input, shape index: {}]   ;;  %s3396_s4 = inlined_call_operand.vmem [shape: f32[1,128], index: 4, kind: input, shape index: {}]   ;;  %s3397_s5 = inlined_call_operand.hbm [shape: bf16[128,128], index: 5, kind: input, shape index: {}]   ;;  %s3398_s6 = inlined_call_operand.vmem [shape: f32[1,128], index: 6, kind: input, shape index: {}]   ;;  %s3399_s7 = inlined_call_operand.hbm [shape: bf16[512,128], index: 7, kind: output, shape index: {}]  }
   0x1   :  { %3404 = sst [smem:[#allocation15_spill]] %s3393_s1 }
   0x2   :  { %12 = vsyncpa [#allocation3], 0 }
   0x3   :  { %14 = vsyncpa [#allocation3 + $0x1], 0 }
   0x4   :  { %15 = vsyncpa [#allocation6], 0 }
   0x5   :  { %16 = vsyncpa [#allocation9], 0 }
   0x6   :  { %17 = vsyncpa [#allocation4], 0 }
   0x7   :  { %19 = vsyncpa [#allocation4 + $0x1], 0  ;;  %s2689_s24 = smov 0   ;;  %s2691_s25 = smov 0  }
   0x8   :  { %s2693_s26 = smov 0   ;;  %s2695_s27 = smov 0  }
   0x9 LB: > { %s2710_s28 = sadd.s32 4294967295, %s2636_s27   ;;  %s1783_s29 = sadd.s32 4294967294, %s2636_s27   ;;  %s2636_s27 = sphi %s2695_s27, %s3425_s27   ;;  %s2632_s26 = sphi %s2693_s26, %s3424_s26   ;;  %s2628_s25 = sphi %s2691_s25, %s3423_s25   ;;  %s2624_s24 = sphi %s2689_s24, %s3422_s24  }
   0xa   : > { %p45_p0 = scmp.ne.s32.totalorder %s2628_s25, %s2624_s24  ;;  %p3400_p1 = scmp.eq.s32.totalorder %s2710_s28, 0 }
   0xb   : > { %p201_p3 = scmp.eq.s32.totalorder %s1783_s29, 1  ;;  %p1784_p5 = scmp.ge.s32.totalorder %s2636_s27, 1 }
   0xc   : > { %p2719_p4 = por %p3400_p1, %p45_p0  ;;  %p208_p7 = scmp.lt.s32.totalorder %s2636_s27, 3 }
   0xd   : > { %p2724_p6 = por %p201_p3, %p45_p0  ;;  %s2638_s10 = smov [#allocation5]  }
   0xe   : > { %s3405_s30 = scalar_select %p2719_p4, 1, 0 }
   0xf   : > { %s3406_s8 = scalar_select %p2724_p6, 1, 0 }
  0x10   : > { %p2729_p8 = pnand %p1784_p5, %p208_p7  ;;  %s220_s11 = sshll.u32 %s2638_s10, 4  ;;  %s221_s11 = int_to_ptr.vmem [resolvable:$true] %s220_s11 }
  0x11   : > { %s2639_s13 = smov [#allocation7]   ;;  %s2640_s15 = smov [#allocation8]  }
  0x12   : > { %s3407_s9 = scalar_select %p2729_p8, 1, 0 }
  0x13   : > { %p2239_p9 = pneg %p2729_p8  ;;  %s236_s14 = sshll.u32 %s2639_s13, 4  ;;  %s237_s14 = int_to_ptr.vmem [resolvable:$true] %s236_s14 }
  0x14   : > { %s252_s16 = sshll.u32 %s2640_s15, 4  ;;  %s2469_s17 = scalar_lea.vmem %s221_s11, 1024  ;;  %s253_s16 = int_to_ptr.vmem [resolvable:$true] %s252_s16 }
  0x15   : > { %p2738_p11 = pnand %p2239_p9, %p3400_p1  ;;  %p2470_p13 = scmp.ne.s32.totalorder %s221_s11, %s2469_s17 }
  0x16   : > { %p2477_p5 = scmp.lt.s32.totalorder %s221_s11, %s221_s11  ;;  %p2478_p7 = scmp.lt.s32.totalorder %s2469_s17, %s2469_s17 }
  0x17   : > { %p2460_p12 = pneg %p2738_p11 }
  0x18   : > { %p2479_p9 = por %p2478_p7, %p2477_p5 }
  0x19   : > { %p2472_p0 = pnand %p2470_p13, %p2460_p12 }
  0x1b   : > { %p2473_p3 = pneg %p2472_p0 }
  0x1d   : > { %p2480_p10 = pnand %p2479_p9, %p2473_p3 }
  0x1f   : > { %2483 = shalt.err (!%p2480_p10)
}
  0x20   : > { %s2641_s18 = smov 64   ;;  %s2642_s19 = smov 4  }
  0x21   : > { %s3409_s1 = sld [smem:[#allocation15_spill]]  ;;  %s2495_s22 = scalar_lea.vmem %s237_s14, 1024 }
  0x22   : > { %p2496_p1 = scmp.ne.s32.totalorder %s237_s14, %s2495_s22  ;;  %p2503_p2 = scmp.lt.s32.totalorder %s237_s14, %s237_s14 }
  0x23   : > { %p2504_p6 = scmp.lt.s32.totalorder %s2495_s22, %s2495_s22 }
  0x24   : > { %p2498_p13 = pnand %p2496_p1, %p2460_p12 }
  0x25   : > { %p2505_p5 = por %p2504_p6, %p2503_p2 }
  0x26   : > { %p2499_p0 = pneg %p2498_p13 }
  0x27   : > { %2242 = dma.hbm_to_vmem [thread:$0]  (!%p2738_p11), %s3409_s1, 1024, %s221_s11, [#allocation6], %s2641_s18, %s2641_s18, %s2642_s19  }
  0x28   : > { %p2506_p3 = pnand %p2505_p5, %p2499_p0 }
  0x2a   : > { %2509 = shalt.err (!%p2506_p3)
}
  0x2b   : > { %2245 = dma.hbm_to_vmem [thread:$0]  (!%p2738_p11), %s3395_s3, 1024, %s237_s14, [#allocation6], %s2641_s18, %s2641_s18, %s2642_s19  }
  0x2c   : > { %s2521_s10 = scalar_lea.vmem %s253_s16, 1024  ;;  %p2529_p9 = scmp.lt.s32.totalorder %s253_s16, %s253_s16 }
  0x2d   : > { %p2522_p10 = scmp.ne.s32.totalorder %s253_s16, %s2521_s10  ;;  %p2530_p13 = scmp.lt.s32.totalorder %s2521_s10, %s2521_s10 }
  0x2f   : > { %p2524_p7 = pnand %p2522_p10, %p2460_p12  ;;  %p2531_p4 = por %p2530_p13, %p2529_p9 }
  0x31   : > { %p2525_p1 = pneg %p2524_p7 }
  0x33   : > { %p2532_p2 = pnand %p2531_p4, %p2525_p1 }
  0x35   : > { %2535 = shalt.err (!%p2532_p2)
}
  0x36   : > { %2248 = dma.hbm_to_vmem [thread:$0]  (!%p2738_p11), %s3397_s5, 1024, %s253_s16, [#allocation9], %s2641_s18, %s2641_s18, %s2642_s19  }
  0x37   : > { %s2769_s14 = sadd.s32 1, %s2636_s27   ;;  %s32_s12 = sadd.s32 1, %s2632_s26 }
  0x38   : > { %s29_s15 = ssub.s32 %s2636_s27, %s2769_s14  ;;  %p39_p6 = scmp.ne.s32.totalorder %s2632_s26, %s2628_s25 }
  0x39   : > { %p30_p4 = scmp.eq.s32.totalorder %s29_s15, 0  ;;  %p40_p12 = scmp.eq.s32.totalorder %s2636_s27, 0 }
  0x3a   : > { %p2260_p0 = scmp.lt.s32.totalorder %s2636_s27, 2  ;;  %p3410_p3 = scmp.eq.s32.totalorder %s2710_s28, 1 }
  0x3b   : > { %s2779_s17 = scalar_select %p30_p4, %s2632_s26, %s32_s12  }
  0x3c   : > { %p41_p5 = por %p40_p12, %p39_p6  ;;  %p2783_p10 = por %p3410_p3, %p39_p6 }
  0x3d   : > { %s269_s21 = sand.u32 1, %s2632_s26   ;;  %s1862_s22 = sshll.u32 %s2636_s27, 12 }
  0x3e   : > { %s3411_s20 = scalar_select %p2783_p10, 1, 0 }
  0x3f   : > { %s1789_s16 = sshll.u32 %s269_s21, 8  ;;  %s2792_s23 = scalar_lea.hbm %s3392_s0, %s1862_s22 }
  0x40   : > { %s273_s29 = scalar_lea.vmem [#allocation2], %s1789_s16  ;;  %p2794_p11 = pnand %p2260_p0, %p41_p5 }
  0x41   : > { %s280_s10 = sshll.u32 %s273_s29, 4  ;;  %s2800_s13 = scalar_lea.sflag [#allocation3], %s269_s21  ;;  %s2798_s10 = int_to_ptr.vmem [resolvable:$true] %s280_s10 }
  0x42   : > { %s2536_s15 = scalar_lea.hbm %s2792_s23, 4096  ;;  %p2538_p1 = pneg %p2794_p11 }
  0x43   : > { %p2537_p7 = scmp.ne.s32.totalorder %s2792_s23, %s2536_s15  ;;  %s2541_s16 = scalar_lea.hbm %s3392_s0, 8192 }
  0x44   : > { %p2542_p2 = scmp.lt.s32.totalorder %s2792_s23, %s3392_s0  ;;  %p2543_p4 = scmp.lt.s32.totalorder %s2541_s16, %s2536_s15 }
  0x45   : > { %p2539_p9 = pnand %p2538_p1, %p2537_p7 }
  0x46   : > { %p2544_p6 = por %p2543_p4, %p2542_p2 }
  0x47   : > { %p2540_p13 = pneg %p2539_p9 }
  0x49   : > { %p2545_p12 = pnand %p2544_p6, %p2540_p13 }
  0x4b   : > { %2548 = shalt.err (!%p2545_p12)
}
  0x4c   : > { %s2549_s21 = scalar_lea.vmem %s2798_s10, 4096  ;;  %s2643_s29 = smov [#allocation2]  }
  0x4d   : > { %p2550_p0 = scmp.ne.s32.totalorder %s2798_s10, %s2549_s21  ;;  %s2554_s1 = sshll.u32 %s2643_s29, 4  ;;  %s2555_s1 = int_to_ptr.vmem [resolvable:$false] %s2554_s1 }
  0x4e   : > { %s2556_s12 = scalar_lea.vmem %s2555_s1, 8192  ;;  %p2557_p7 = scmp.lt.s32.totalorder %s2798_s10, %s2555_s1 }
  0x4f   : > { %p2552_p5 = pnand %p2550_p0, %p2538_p1  ;;  %p2558_p9 = scmp.lt.s32.totalorder %s2556_s12, %s2549_s21 }
  0x51   : > { %p2553_p3 = pneg %p2552_p5  ;;  %p2559_p10 = por %p2558_p9, %p2557_p7 }
  0x53   : > { %p2560_p8 = pnand %p2559_p10, %p2553_p3 }
  0x55   : > { %2563 = shalt.err (!%p2560_p8)
}
  0x56   : > { %s2644_s15 = smov 128   ;;  %s2645_s22 = smov 8  }
  0x57   : > { %2252 = dma.hbm_to_vmem [thread:$0]  (!%p2794_p11), %s2792_s23, 4096, %s2798_s10, %s2800_s13, %s2644_s15, %s2644_s15, %s2645_s22  }
  0x58   : > { %p3413_p1 = scmp.ne.s32.totalorder %s3407_s9, 0 }
  0x59   : > { %s2824_s16 = sand.u32 (!%p3413_p1), 1, %s2628_s25   ;;  %p3414_p8 = scmp.ne.s32.totalorder (!%p3413_p1), %s3405_s30, 0 }
  0x5a   : > { %292 = sbr.rel (%p3413_p1) target bundleno = 1135 (0x46f), region = 48  ;;  %s1793_s1 = sshll.u32 (!%p3413_p1), %s2824_s16, 8 }
  0x5b   : > { %s295_s18 = scalar_lea.sflag (!%p3413_p1), [#allocation3], %s2824_s16  ;;  %s2828_s19 = scalar_lea.vmem (!%p3413_p1), [#allocation2], %s1793_s1 }
  0x5f   : > { %2607 = dma.done.wait (%p3414_p8), %s295_s18, 4096  }
  0x60   : > { %2609 = vsyncadd (%p3414_p8), %s295_s18, 4294963200  ;;  %p3415_p10 = scmp.eq.s32.totalorder %s2710_s28, 0 }
  0x62   : > { %2611 = dma.done.wait (%p3415_p10), [#allocation6], 2048   ;;  %p3416_p11 = pmov %p3415_p10 }
  0x63   : > { %p3417_p13 = pmov %p3415_p10 }
  0x64   : > { %2613 = vsyncadd (%p3416_p11), [#allocation6], 4294965248 }
  0x65   : > { %2615 = dma.done.wait (%p3417_p13), [#allocation9], 1024   ;;  %p3418_p2 = pmov %p3415_p10 }
  0x66   : > { %v2306_v0 = vld [vmem:[#allocation5 + $0x38] sm:$0xff]   ;;  %v2307_v1 = vld [vmem:[#allocation5 + $0x30] sm:$0xff]   ;;  %v2308_v2 = vld [vmem:[#allocation5 + $0x28] sm:$0xff]   ;;  %s1797_s21 = sshll.u32 %s2824_s16, 7  ;;  %s1895_s12 = sshll.u32 %s2710_s28, 11 }
  0x67   : > { %2617 = vsyncadd (%p3418_p2), [#allocation9], 4294966272  ;;  %2063 = vmatprep.subr.bf16.mxu0 %v2306_v0  ;;  %2207 = vmatprep.subr.bf16.mxu1 %v2306_v0  ;;  %v2309_v3 = vld [vmem:[#allocation5 + $0x20] sm:$0xff]   ;;  %v345_v5 = vld [vmem:[%s2828_s19 + $0x8] sm:$0xff]  ;;  %s3294_s29 = scalar_lea.vmem [#allocation10], %s1797_s21  ;;  %s3346_s18 = scalar_lea.hbm %s3399_s7, %s1895_s12 }
  0x68   : > { %2064 = vmatpush3.bf16.msra.mxu0 %v2306_v0  ;;  %2215 = vmatpush3.bf16.msra.mxu1 %v2306_v0  ;;  %v344_v4 = vld [vmem:[%s2828_s19] sm:$0xff]  ;;  %v2310_v7 = vld [vmem:[#allocation5 + $0x18] sm:$0xff]   ;;  %v361_v9 = vld [vmem:[%s2828_s19 + $0x88] sm:$0xff]  ;;  %s1681_s15 = sshll.u32 %s3294_s29, 4  ;;  %s1668_s28 = scalar_lea.sflag [#allocation4], %s2824_s16  ;;  %s3348_s15 = int_to_ptr.vmem [resolvable:$true] %s1681_s15 }
  0x69   : > { %2065 = vmatprep.subr.bf16.mxu0 %v2307_v1  ;;  %2208 = vmatprep.subr.bf16.mxu1 %v2307_v1  ;;  %v376_v6 = vpack.c.bf16 %v345_v5, %v344_v4  ;;  %v360_v8 = vld [vmem:[%s2828_s19 + $0x80] sm:$0xff]  ;;  %v2311_v11 = vld [vmem:[#allocation5 + $0x10] sm:$0xff]   ;;  %v2312_v12 = vld [vmem:[#allocation5 + $0x8] sm:$0xff]   ;;  %p3419_p6 = scmp.ne.s32.totalorder %s3411_s20, 0  ;;  %s2646_s30 = smov [#allocation10]  }
  0x6a   : > { %v384_v10 = vpack.c.bf16 %v361_v9, %v360_v8  ;;  %v2313_v13 = vld [vmem:[#allocation5] sm:$0xff]   ;;  %v346_v14 = vld [vmem:[%s2828_s19 + $0x10] sm:$0xff]  ;;  %v347_v15 = vld [vmem:[%s2828_s19 + $0x18] sm:$0xff]  ;;  %s2568_s9 = sshll.u32 %s2646_s30, 4  ;;  %s2569_s9 = int_to_ptr.vmem [resolvable:$false] %s2568_s9 }
  0x6b   : > { %2079 = vmatprep.mubr.bf16.mxu0 %v376_v6  ;;  %v348_v16 = vld [vmem:[%s2828_s19 + $0x20] sm:$0xff]  ;;  %v349_v17 = vld [vmem:[%s2828_s19 + $0x28] sm:$0xff]  ;;  %v362_v18 = vld [vmem:[%s2828_s19 + $0x90] sm:$0xff]  ;;  %v377_v23 = vpack.c.bf16 %v347_v15, %v346_v14  ;;  %s2570_s23 = scalar_lea.vmem %s2569_s9, 4096  ;;  %p2571_p5 = scmp.lt.s32.totalorder %s3348_s15, %s2569_s9 }
  0x6c   : > { %2066 = vmatpush3.bf16.msra.mxu0 %v2307_v1  ;;  %2216 = vmatpush3.bf16.msra.mxu1 %v2307_v1  ;;  %v363_v19 = vld [vmem:[%s2828_s19 + $0x98] sm:$0xff]  ;;  %v364_v20 = vld [vmem:[%s2828_s19 + $0xa0] sm:$0xff]  ;;  %v365_v21 = vld [vmem:[%s2828_s19 + $0xa8] sm:$0xff]  ;;  %v378_v24 = vpack.c.bf16 %v349_v17, %v348_v16 }
  0x6d   : > { %2067 = vmatprep.subr.bf16.mxu0 %v2308_v2  ;;  %2209 = vmatprep.subr.bf16.mxu1 %v2308_v2  ;;  %v2314_v22 = vld [vmem:[#allocation7 + $0x38] sm:$0xff]   ;;  %v385_v25 = vpack.c.bf16 %v363_v19, %v362_v18  ;;  %v386_v26 = vpack.c.bf16 %v365_v21, %v364_v20  ;;  %v2315_v27 = vld [vmem:[#allocation7 + $0x30] sm:$0xff]   ;;  %v352_v30 = vld [vmem:[%s2828_s19 + $0x40] sm:$0xff] }
  0x6e   : > { %2095 = vmatprep.mubr.bf16.mxu1 %v384_v10  ;;  %v350_v28 = vld [vmem:[%s2828_s19 + $0x30] sm:$0xff]  ;;  %v351_v29 = vld [vmem:[%s2828_s19 + $0x38] sm:$0xff]  ;;  %v353_v31 = vld [vmem:[%s2828_s19 + $0x48] sm:$0xff] }
  0x6f   : > { %v366_v32 = vld [vmem:[%s2828_s19 + $0xb0] sm:$0xff]  ;;  %v367_v33 = vld [vmem:[%s2828_s19 + $0xb8] sm:$0xff]  ;;  %v368_v34 = vld [vmem:[%s2828_s19 + $0xc0] sm:$0xff]  ;;  %v379_v37 = vpack.c.bf16 %v351_v29, %v350_v28  ;;  %v380_v38 = vpack.c.bf16 %v353_v31, %v352_v30 }
  0x70   : > { %2068 = vmatpush3.bf16.msra.mxu0 %v2308_v2  ;;  %2217 = vmatpush3.bf16.msra.mxu1 %v2308_v2  ;;  %v369_v35 = vld [vmem:[%s2828_s19 + $0xc8] sm:$0xff]  ;;  %v387_v39 = vpack.c.bf16 %v367_v33, %v366_v32  ;;  %v2317_v41 = vld [vmem:[#allocation7 + $0x20] sm:$0xff]   ;;  %v354_v42 = vld [vmem:[%s2828_s19 + $0x50] sm:$0xff] }
  0x71   : > { %2069 = vmatprep.subr.bf16.mxu0 %v2309_v3  ;;  %2210 = vmatprep.subr.bf16.mxu1 %v2309_v3  ;;  %v2316_v36 = vld [vmem:[#allocation7 + $0x28] sm:$0xff]   ;;  %v388_v40 = vpack.c.bf16 %v369_v35, %v368_v34  ;;  %v355_v43 = vld [vmem:[%s2828_s19 + $0x58] sm:$0xff]  ;;  %v356_v44 = vld [vmem:[%s2828_s19 + $0x60] sm:$0xff] }
  0x72   : > { %v357_v45 = vld [vmem:[%s2828_s19 + $0x68] sm:$0xff]  ;;  %v370_v46 = vld [vmem:[%s2828_s19 + $0xd0] sm:$0xff]  ;;  %v371_v47 = vld [vmem:[%s2828_s19 + $0xd8] sm:$0xff]  ;;  %v381_v51 = vpack.c.bf16 %v355_v43, %v354_v42 }
  0x73   : > { %v372_v48 = vld [vmem:[%s2828_s19 + $0xe0] sm:$0xff]  ;;  %v373_v49 = vld [vmem:[%s2828_s19 + $0xe8] sm:$0xff]  ;;  %v2318_v50 = vld [vmem:[#allocation7 + $0x18] sm:$0xff]   ;;  %v382_v52 = vpack.c.bf16 %v357_v45, %v356_v44  ;;  %v389_v53 = vpack.c.bf16 %v371_v47, %v370_v46 }
  0x74   : > { %2070 = vmatpush3.bf16.msra.mxu0 %v2309_v3  ;;  %2218 = vmatpush3.bf16.msra.mxu1 %v2309_v3  ;;  %v390_v54 = vpack.c.bf16 %v373_v49, %v372_v48  ;;  %v358_v55 = vld [vmem:[%s2828_s19 + $0x70] sm:$0xff]  ;;  %v359_v56 = vld [vmem:[%s2828_s19 + $0x78] sm:$0xff]  ;;  %v2320_v62 = vld [vmem:[#allocation7 + $0x8] sm:$0xff]  }
  0x75   : > { %2071 = vmatprep.subr.bf16.mxu0 %v2310_v7  ;;  %2211 = vmatprep.subr.bf16.mxu1 %v2310_v7  ;;  %v374_v57 = vld [vmem:[%s2828_s19 + $0xf0] sm:$0xff]  ;;  %v375_v58 = vld [vmem:[%s2828_s19 + $0xf8] sm:$0xff]  ;;  %v383_v59 = vpack.c.bf16 %v359_v56, %v358_v55  ;;  %v2321_v63 = vld [vmem:[#allocation7] sm:$0xff]   ;;  %s2564_s19 = scalar_lea.vmem %s3348_s15, 2048 }
  0x76   : > { %v391_v60 = vpack.c.bf16 %v375_v58, %v374_v57  ;;  %v2319_v61 = vld [vmem:[#allocation7 + $0x10] sm:$0xff]   ;;  %v2322_v0 = vld [vmem:[#allocation8 + $0x38] sm:$0xff]   ;;  %v2324_v2 = vld [vmem:[#allocation8 + $0x28] sm:$0xff]   ;;  %p2565_p4 = scmp.ne.s32.totalorder %s3348_s15, %s2564_s19  ;;  %p2572_p3 = scmp.lt.s32.totalorder %s2570_s23, %s2564_s19 }
  0x77   : > { %v2323_v1 = vld [vmem:[#allocation8 + $0x30] sm:$0xff]   ;;  %v2325_v3 = vld [vmem:[#allocation8 + $0x20] sm:$0xff]   ;;  %v2326_v4 = vld [vmem:[#allocation8 + $0x18] sm:$0xff]  }
  0x78   : > { %2072 = vmatpush3.bf16.msra.mxu0 %v2310_v7  ;;  %2219 = vmatpush3.bf16.msra.mxu1 %v2310_v7  ;;  %v2879_v8 = vld [vmem:[%s3394_s2] ss:$0 sm:$0xff]  ;;  %p2566_p12 = pnand %p2565_p4, %p3419_p6  ;;  %p2573_p7 = por %p2572_p3, %p2571_p5 }
  0x79   : > { %2073 = vmatprep.subr.bf16.mxu0 %v2311_v11  ;;  %2212 = vmatprep.subr.bf16.mxu1 %v2311_v11 }
  0x7a   : > { %p2567_p0 = pneg %p2566_p12 }
  0x7c   : > { %2074 = vmatpush3.bf16.msra.mxu0 %v2311_v11  ;;  %2220 = vmatpush3.bf16.msra.mxu1 %v2311_v11  ;;  %p2574_p9 = pnand %p2573_p7, %p2567_p0 }
  0x7d   : > { %2075 = vmatprep.subr.bf16.mxu0 %v2312_v12  ;;  %2213 = vmatprep.subr.bf16.mxu1 %v2312_v12 }
  0x80   : > { %2076 = vmatpush3.bf16.msra.mxu0 %v2312_v12  ;;  %2221 = vmatpush3.bf16.msra.mxu1 %v2312_v12 }
  0x81   : > { %2077 = vmatprep.subr.bf16.mxu0 %v2313_v13  ;;  %2214 = vmatprep.subr.bf16.mxu1 %v2313_v13 }
  0x84   : > { %2078 = vmatpush3.bf16.msra.mxu0 %v2313_v13  ;;  %2222 = vmatpush3.bf16.msra.mxu1 %v2313_v13 }
  0x85   : > { %2111 = vmatprep.subr.bf16.mxu1 %v2314_v22  ;;  %2159 = vmatprep.subr.bf16.mxu0 %v2322_v0 }
  0x87   : > { %2080 = vmatmul.mubr.bf16.vlgmr.msra.gmra.mxu0 %v377_v23  ;;  %2096 = vmatmul.mubr.bf16.vlgmr.msra.gmra.mxu1 %v385_v25 }
  0x88   : > { %2083 = vmatprep.mubr.bf16.mxu0 %v378_v24  ;;  %2099 = vmatprep.mubr.bf16.mxu1 %v386_v26 }
  0x89   : > { %2112 = vmatpush3.bf16.msra.mxu1 %v2314_v22  ;;  %2160 = vmatpush3.bf16.msra.mxu0 %v2322_v0 }
  0x8a   : > { %2113 = vmatprep.subr.bf16.mxu1 %v2315_v27  ;;  %2161 = vmatprep.subr.bf16.mxu0 %v2323_v1 }
  0x8d   : > { %2114 = vmatpush3.bf16.msra.mxu1 %v2315_v27  ;;  %2162 = vmatpush3.bf16.msra.mxu0 %v2323_v1 }
  0x8e   : > { %2115 = vmatprep.subr.bf16.mxu1 %v2316_v36  ;;  %2163 = vmatprep.subr.bf16.mxu0 %v2324_v2 }
  0x8f   : > { %2084 = vmatmul.mubr.bf16.gmra.mxu0 %v379_v37  ;;  %2100 = vmatmul.mubr.bf16.gmra.mxu1 %v387_v39 }
  0x90   : > { %2087 = vmatprep.mubr.bf16.mxu0 %v380_v38  ;;  %2103 = vmatprep.mubr.bf16.mxu1 %v388_v40 }
  0x91   : > { %2116 = vmatpush3.bf16.msra.mxu1 %v2316_v36  ;;  %2164 = vmatpush3.bf16.msra.mxu0 %v2324_v2 }
  0x92   : > { %2117 = vmatprep.subr.bf16.mxu1 %v2317_v41  ;;  %2165 = vmatprep.subr.bf16.mxu0 %v2325_v3 }
  0x95   : > { %2118 = vmatpush3.bf16.msra.mxu1 %v2317_v41  ;;  %2166 = vmatpush3.bf16.msra.mxu0 %v2325_v3 }
  0x96   : > { %2119 = vmatprep.subr.bf16.mxu1 %v2318_v50  ;;  %2167 = vmatprep.subr.bf16.mxu0 %v2326_v4 }
  0x97   : > { %2088 = vmatmul.mubr.bf16.gmra.mxu0 %v381_v51  ;;  %2104 = vmatmul.mubr.bf16.gmra.mxu1 %v389_v53 }
  0x98   : > { %2091 = vmatprep.mubr.bf16.mxu0 %v382_v52  ;;  %2107 = vmatprep.mubr.bf16.mxu1 %v390_v54 }
  0x99   : > { %2120 = vmatpush3.bf16.msra.mxu1 %v2318_v50  ;;  %2168 = vmatpush3.bf16.msra.mxu0 %v2326_v4 }
  0x9a   : > { %2121 = vmatprep.subr.bf16.mxu1 %v2319_v61 }
  0x9d   : > { %2122 = vmatpush3.bf16.msra.mxu1 %v2319_v61 }
  0x9e   : > { %2123 = vmatprep.subr.bf16.mxu1 %v2320_v62 }
  0x9f   : > { %2092 = vmatmul.mubr.bf16.gmra.mxu0 %v383_v59  ;;  %2108 = vmatmul.mubr.bf16.gmra.mxu1 %v391_v60 }
  0xa1   : > { %2124 = vmatpush3.bf16.msra.mxu1 %v2320_v62 }
  0xa2   : > { %2125 = vmatprep.subr.bf16.mxu1 %v2321_v63 }
  0xa5   : > { %2126 = vmatpush3.bf16.msra.mxu1 %v2321_v63 }
 0x147   : > { %v2081_v5 = vpop.f32.mrf.mxu0  ;;  %v2874_v6 = vpop.f32.mrf.mxu1 }
 0x148   : > { %v506_v14 = vadd.f32 %v2081_v5, %v2879_v8 }
 0x149   : > { %v497_v7 = vpop.f32.mrf.mxu0  ;;  %v561_v9 = vpop.f32.mrf.mxu1 }
 0x14a   : > { %v498_v11 = vadd.f32 %v2879_v8, %v497_v7  ;;  %v626_v23 = vmax.f32 %v506_v14, 0.0  ;;  %v562_v59 = vadd.f32 %v2879_v8, %v561_v9 }
 0x14b   : > { %v2082_v10 = vpop.f32.mrf.mxu0  ;;  %v2883_v13 = vpop.f32.mrf.mxu1 }
 0x14c   : > { %v509_v12 = vadd.f32 %v2082_v10, %v2879_v8  ;;  %v624_v20 = vmax.f32 %v498_v11, 0.0  ;;  %v640_v4 = vmax.f32 %v562_v59, 0.0 }
 0x14d   : > { %v500_v15 = vpop.f32.mrf.mxu0  ;;  %v564_v17 = vpop.f32.mrf.mxu1 }
 0x14e   : > { %v501_v16 = vadd.f32 %v2879_v8, %v500_v15  ;;  %v627_v18 = vmax.f32 %v509_v12, 0.0  ;;  %v565_v60 = vadd.f32 %v2879_v8, %v564_v17 }
 0x14f   : > { %v2085_v19 = vpop.f32.mrf.mxu0  ;;  %v2887_v22 = vpop.f32.mrf.mxu1 }
 0x150   : > { %v625_v21 = vmax.f32 %v501_v16, 0.0  ;;  %v657_v27 = vpack.c.bf16 %v627_v18, %v626_v23  ;;  %v522_v32 = vadd.f32 %v2085_v19, %v2879_v8  ;;  %v641_v7 = vmax.f32 %v565_v60, 0.0 }
 0x151   : > { %v513_v24 = vpop.f32.mrf.mxu0  ;;  %v577_v26 = vpop.f32.mrf.mxu1  ;;  %v570_v19 = vadd.f32 %v2874_v6, %v2879_v8  ;;  %v586_v6 = vadd.f32 %v2887_v22, %v2879_v8 }
 0x152   : > { %v656_v25 = vpack.c.bf16 %v625_v21, %v624_v20  ;;  %v514_v29 = vadd.f32 %v2879_v8, %v513_v24  ;;  %v630_v40 = vmax.f32 %v522_v32, 0.0  ;;  %v664_v16 = vpack.c.bf16 %v641_v7, %v640_v4 }
 0x153   : > { %v2086_v28 = vpop.f32.mrf.mxu0  ;;  %v2891_v31 = vpop.f32.mrf.mxu1  ;;  %v578_v17 = vadd.f32 %v2879_v8, %v577_v26  ;;  %v573_v21 = vadd.f32 %v2883_v13, %v2879_v8 }
 0x154   : > { %v525_v30 = vadd.f32 %v2086_v28, %v2879_v8  ;;  %2127 = vmatprep.mubr.bf16.mxu1 %v656_v25  ;;  %v628_v38 = vmax.f32 %v514_v29, 0.0  ;;  %v589_v13 = vadd.f32 %v2891_v31, %v2879_v8 }
 0x155   : > { %v516_v33 = vpop.f32.mrf.mxu0  ;;  %2128 = vmatmul.mubr.bf16.vlgmr.msra.gmra.mxu1 %v657_v27  ;;  %v580_v37 = vpop.f32.mrf.mxu1  ;;  %v644_v24 = vmax.f32 %v578_v17, 0.0  ;;  %v642_v27 = vmax.f32 %v570_v19, 0.0  ;;  %v643_v28 = vmax.f32 %v573_v21, 0.0 }
 0x156   : > { %v517_v34 = vadd.f32 %v2879_v8, %v516_v33  ;;  %v631_v35 = vmax.f32 %v525_v30, 0.0  ;;  %v581_v18 = vadd.f32 %v2879_v8, %v580_v37  ;;  %v646_v37 = vmax.f32 %v586_v6, 0.0 }
 0x157   : > { %v2089_v36 = vpop.f32.mrf.mxu0  ;;  %v2895_v45 = vpop.f32.mrf.mxu1  ;;  %v665_v33 = vpack.c.bf16 %v643_v28, %v642_v27 }
 0x158   : > { %v629_v39 = vmax.f32 %v517_v34, 0.0  ;;  %v659_v43 = vpack.c.bf16 %v631_v35, %v630_v40  ;;  %v538_v48 = vadd.f32 %v2089_v36, %v2879_v8  ;;  %v645_v25 = vmax.f32 %v581_v18, 0.0 }
 0x159   : > { %v529_v41 = vpop.f32.mrf.mxu0  ;;  %v593_v53 = vpop.f32.mrf.mxu1  ;;  %v602_v22 = vadd.f32 %v2895_v45, %v2879_v8  ;;  %v2327_v45 = vld [vmem:[#allocation8 + $0x10] sm:$0xff]  }
 0x15a   : > { %v658_v42 = vpack.c.bf16 %v629_v39, %v628_v38  ;;  %v530_v46 = vadd.f32 %v2879_v8, %v529_v41  ;;  %v634_v56 = vmax.f32 %v538_v48, 0.0  ;;  %v666_v30 = vpack.c.bf16 %v645_v25, %v644_v24  ;;  %2169 = vmatprep.subr.bf16.mxu0 %v2327_v45 }
 0x15b   : > { %v2090_v44 = vpop.f32.mrf.mxu0  ;;  %v2106_v63 = vpop.f32.mrf.mxu1  ;;  %v594_v26 = vadd.f32 %v2879_v8, %v593_v53  ;;  %v647_v38 = vmax.f32 %v589_v13, 0.0  ;;  %2170 = vmatpush3.bf16.msra.mxu0 %v2327_v45 }
 0x15c   : > { %v541_v47 = vadd.f32 %v2090_v44, %v2879_v8  ;;  %2131 = vmatprep.mubr.bf16.mxu1 %v658_v42  ;;  %v632_v54 = vmax.f32 %v530_v46, 0.0  ;;  %v605_v44 = vadd.f32 %v2106_v63, %v2879_v8 }
 0x15d   : > { %v532_v49 = vpop.f32.mrf.mxu0  ;;  %2132 = vmatmul.mubr.bf16.gmra.mxu1 %v659_v43  ;;  %v596_v9 = vpop.f32.mrf.mxu1  ;;  %v648_v35 = vmax.f32 %v594_v26, 0.0  ;;  %v667_v43 = vpack.c.bf16 %v647_v38, %v646_v37 }
 0x15e   : > { %v533_v50 = vadd.f32 %v2879_v8, %v532_v49  ;;  %v635_v51 = vmax.f32 %v541_v47, 0.0  ;;  %v597_v32 = vadd.f32 %v2879_v8, %v596_v9  ;;  %v650_v47 = vmax.f32 %v602_v22, 0.0 }
 0x15f   : > { %v2093_v52 = vpop.f32.mrf.mxu0  ;;  %v2109_v23 = vpop.f32.mrf.mxu1  ;;  %v651_v48 = vmax.f32 %v605_v44, 0.0 }
 0x160   : > { %v633_v55 = vmax.f32 %v533_v50, 0.0  ;;  %v661_v61 = vpack.c.bf16 %v635_v51, %v634_v56  ;;  %v554_v2 = vadd.f32 %v2093_v52, %v2879_v8  ;;  %v649_v36 = vmax.f32 %v597_v32, 0.0  ;;  %v2328_v56 = vld [vmem:[#allocation8 + $0x8] sm:$0xff]  }
 0x161   : > { %v545_v57 = vpop.f32.mrf.mxu0  ;;  %v609_v29 = vpop.f32.mrf.mxu1  ;;  %v669_v50 = vpack.c.bf16 %v651_v48, %v650_v47  ;;  %v618_v51 = vadd.f32 %v2109_v23, %v2879_v8  ;;  %2171 = vmatprep.subr.bf16.mxu0 %v2328_v56 }
 0x162   : > { %v660_v58 = vpack.c.bf16 %v633_v55, %v632_v54  ;;  %v546_v0 = vadd.f32 %v2879_v8, %v545_v57  ;;  %v638_v14 = vmax.f32 %v554_v2, 0.0  ;;  %v668_v40 = vpack.c.bf16 %v649_v36, %v648_v35  ;;  %2172 = vmatpush3.bf16.msra.mxu0 %v2328_v56  ;;  %v2329_v57 = vld [vmem:[#allocation8] sm:$0xff]  }
 0x163   : > { %v2094_v62 = vpop.f32.mrf.mxu0  ;;  %v2110_v34 = vpop.f32.mrf.mxu1  ;;  %v610_v41 = vadd.f32 %v2879_v8, %v609_v29  ;;  %v654_v53 = vmax.f32 %v618_v51, 0.0  ;;  %2173 = vmatprep.subr.bf16.mxu0 %v2329_v57 }
 0x164   : > { %v557_v1 = vadd.f32 %v2094_v62, %v2879_v8  ;;  %2135 = vmatprep.mubr.bf16.mxu1 %v660_v58  ;;  %v636_v11 = vmax.f32 %v546_v0, 0.0  ;;  %v621_v52 = vadd.f32 %v2110_v34, %v2879_v8 }
 0x165   : > { %v548_v3 = vpop.f32.mrf.mxu0  ;;  %2136 = vmatmul.mubr.bf16.gmra.mxu1 %v661_v61  ;;  %v612_v39 = vpop.f32.mrf.mxu1  ;;  %v652_v31 = vmax.f32 %v610_v41, 0.0 }
 0x166   : > { %v549_v5 = vadd.f32 %v2879_v8, %v548_v3  ;;  %v639_v10 = vmax.f32 %v557_v1, 0.0  ;;  %v613_v42 = vadd.f32 %v2879_v8, %v612_v39  ;;  %v655_v54 = vmax.f32 %v621_v52, 0.0  ;;  %2174 = vmatpush3.bf16.msra.mxu0 %v2329_v57  ;;  %v2929_v8 = vld [vmem:[%s3396_s4] ss:$0 sm:$0xff] }
 0x168   : > { %v637_v12 = vmax.f32 %v549_v5, 0.0  ;;  %v663_v20 = vpack.c.bf16 %v639_v10, %v638_v14  ;;  %v653_v46 = vmax.f32 %v613_v42, 0.0  ;;  %v671_v55 = vpack.c.bf16 %v655_v54, %v654_v53 }
 0x16a   : > { %v662_v15 = vpack.c.bf16 %v637_v12, %v636_v11  ;;  %v670_v49 = vpack.c.bf16 %v653_v46, %v652_v31 }
 0x16c   : > { %2139 = vmatprep.mubr.bf16.mxu1 %v662_v15 }
 0x16d   : > { %2140 = vmatmul.mubr.bf16.gmra.mxu1 %v663_v20 }
 0x16e   : > { %2143 = vmatprep.mubr.bf16.mxu1 %v664_v16 }
 0x175   : > { %2144 = vmatmul.mubr.bf16.gmra.mxu1 %v665_v33 }
 0x176   : > { %2147 = vmatprep.mubr.bf16.mxu1 %v666_v30 }
 0x17d   : > { %2148 = vmatmul.mubr.bf16.gmra.mxu1 %v667_v43 }
 0x17e   : > { %2151 = vmatprep.mubr.bf16.mxu1 %v668_v40 }
 0x185   : > { %2152 = vmatmul.mubr.bf16.gmra.mxu1 %v669_v50 }
 0x186   : > { %2155 = vmatprep.mubr.bf16.mxu1 %v670_v49 }
 0x18d   : > { %2156 = vmatmul.mubr.bf16.gmra.mxu1 %v671_v55 }
 0x215   : > { %v2129_v58 = vpop.f32.mrf.mxu1 }
 0x216   : > { %v786_v63 = vadd.f32 %v2129_v58, %v2929_v8 }
 0x217   : > { %v777_v59 = vpop.f32.mrf.mxu1 }
 0x218   : > { %v778_v61 = vadd.f32 %v2929_v8, %v777_v59  ;;  %v906_v7 = vmax.f32 %v786_v63, 0.0 }
 0x219   : > { %v2130_v60 = vpop.f32.mrf.mxu1 }
 0x21a   : > { %v789_v62 = vadd.f32 %v2130_v60, %v2929_v8  ;;  %v904_v4 = vmax.f32 %v778_v61, 0.0 }
 0x21b   : > { %v780_v0 = vpop.f32.mrf.mxu1 }
 0x21c   : > { %v781_v1 = vadd.f32 %v2929_v8, %v780_v0  ;;  %v907_v2 = vmax.f32 %v789_v62, 0.0 }
 0x21d   : > { %v2133_v3 = vpop.f32.mrf.mxu1 }
 0x21e   : > { %v905_v5 = vmax.f32 %v781_v1, 0.0  ;;  %v937_v11 = vpack.c.bf16 %v907_v2, %v906_v7  ;;  %v802_v16 = vadd.f32 %v2133_v3, %v2929_v8 }
 0x21f   : > { %v793_v10 = vpop.f32.mrf.mxu1 }
 0x220   : > { %v936_v9 = vpack.c.bf16 %v905_v5, %v904_v4  ;;  %v794_v14 = vadd.f32 %v2929_v8, %v793_v10  ;;  %v910_v24 = vmax.f32 %v802_v16, 0.0 }
 0x221   : > { %v2134_v12 = vpop.f32.mrf.mxu1 }
 0x222   : > { %v805_v15 = vadd.f32 %v2134_v12, %v2929_v8  ;;  %2175 = vmatprep.mubr.bf16.mxu0 %v936_v9  ;;  %v908_v21 = vmax.f32 %v794_v14, 0.0 }
 0x223   : > { %v796_v17 = vpop.f32.mrf.mxu1  ;;  %2176 = vmatmul.mubr.bf16.vlgmr.msra.gmra.mxu0 %v937_v11 }
 0x224   : > { %v797_v18 = vadd.f32 %v2929_v8, %v796_v17  ;;  %v911_v19 = vmax.f32 %v805_v15, 0.0 }
 0x225   : > { %v2137_v20 = vpop.f32.mrf.mxu1 }
 0x226   : > { %v909_v23 = vmax.f32 %v797_v18, 0.0  ;;  %v939_v28 = vpack.c.bf16 %v911_v19, %v910_v24  ;;  %v818_v32 = vadd.f32 %v2137_v20, %v2929_v8 }
 0x227   : > { %v809_v25 = vpop.f32.mrf.mxu1 }
 0x228   : > { %v938_v27 = vpack.c.bf16 %v909_v23, %v908_v21  ;;  %v810_v30 = vadd.f32 %v2929_v8, %v809_v25  ;;  %v914_v37 = vmax.f32 %v818_v32, 0.0 }
 0x229   : > { %v2138_v29 = vpop.f32.mrf.mxu1 }
 0x22a   : > { %v821_v26 = vadd.f32 %v2138_v29, %v2929_v8  ;;  %2179 = vmatprep.mubr.bf16.mxu0 %v938_v27  ;;  %v912_v35 = vmax.f32 %v810_v30, 0.0 }
 0x22b   : > { %v812_v33 = vpop.f32.mrf.mxu1  ;;  %2180 = vmatmul.mubr.bf16.gmra.mxu0 %v939_v28 }
 0x22c   : > { %v813_v6 = vadd.f32 %v2929_v8, %v812_v33  ;;  %v915_v13 = vmax.f32 %v821_v26, 0.0 }
 0x22d   : > { %v2141_v34 = vpop.f32.mrf.mxu1 }
 0x22e   : > { %v913_v36 = vmax.f32 %v813_v6, 0.0  ;;  %v941_v40 = vpack.c.bf16 %v915_v13, %v914_v37  ;;  %v834_v22 = vadd.f32 %v2141_v34, %v2929_v8 }
 0x22f   : > { %v825_v38 = vpop.f32.mrf.mxu1 }
 0x230   : > { %v940_v39 = vpack.c.bf16 %v913_v36, %v912_v35  ;;  %v826_v42 = vadd.f32 %v2929_v8, %v825_v38  ;;  %v918_v50 = vmax.f32 %v834_v22, 0.0 }
 0x231   : > { %v2142_v41 = vpop.f32.mrf.mxu1 }
 0x232   : > { %v837_v43 = vadd.f32 %v2142_v41, %v2929_v8  ;;  %2183 = vmatprep.mubr.bf16.mxu0 %v940_v39  ;;  %v916_v48 = vmax.f32 %v826_v42, 0.0 }
 0x233   : > { %v828_v44 = vpop.f32.mrf.mxu1  ;;  %2184 = vmatmul.mubr.bf16.gmra.mxu0 %v941_v40 }
 0x234   : > { %v829_v31 = vadd.f32 %v2929_v8, %v828_v44  ;;  %v919_v46 = vmax.f32 %v837_v43, 0.0 }
 0x235   : > { %v2145_v47 = vpop.f32.mrf.mxu1 }
 0x236   : > { %v917_v49 = vmax.f32 %v829_v31, 0.0  ;;  %v943_v53 = vpack.c.bf16 %v919_v46, %v918_v50  ;;  %v850_v56 = vadd.f32 %v2145_v47, %v2929_v8  ;;  %v1184_v31 = vlaneseq  ;;  %v2968_v47 = vld [vmem:[%s3398_s6] ss:$0 sm:$0xff] }
 0x237   : > { %v841_v51 = vpop.f32.mrf.mxu1 }
 0x238   : > { %v942_v52 = vpack.c.bf16 %v917_v49, %v916_v48  ;;  %v842_v55 = vadd.f32 %v2929_v8, %v841_v51  ;;  %v922_v63 = vmax.f32 %v850_v56, 0.0  ;;  %v2963_v46 = vand.u32 127, %v1184_v31 }
 0x239   : > { %v2146_v54 = vpop.f32.mrf.mxu1 }
 0x23a   : > { %v853_v45 = vadd.f32 %v2146_v54, %v2929_v8  ;;  %2187 = vmatprep.mubr.bf16.mxu0 %v942_v52  ;;  %v920_v61 = vmax.f32 %v842_v55, 0.0  ;;  %vm1186_vm0 = vcmp.lt.s32.totalorder %v2963_v46, 16 }
 0x23b   : > { %v844_v57 = vpop.f32.mrf.mxu1  ;;  %2188 = vmatmul.mubr.bf16.gmra.mxu0 %v943_v53 }
 0x23c   : > { %v845_v58 = vadd.f32 %v2929_v8, %v844_v57  ;;  %v923_v59 = vmax.f32 %v853_v45, 0.0 }
 0x23d   : > { %v2149_v60 = vpop.f32.mrf.mxu1 }
 0x23e   : > { %v921_v62 = vmax.f32 %v845_v58, 0.0  ;;  %v945_v2 = vpack.c.bf16 %v923_v59, %v922_v63  ;;  %v866_v7 = vadd.f32 %v2149_v60, %v2929_v8 }
 0x23f   : > { %v857_v0 = vpop.f32.mrf.mxu1 }
 0x240   : > { %v944_v1 = vpack.c.bf16 %v921_v62, %v920_v61  ;;  %v858_v4 = vadd.f32 %v2929_v8, %v857_v0  ;;  %v926_v16 = vmax.f32 %v866_v7, 0.0 }
 0x241   : > { %v2150_v3 = vpop.f32.mrf.mxu1 }
 0x242   : > { %v869_v5 = vadd.f32 %v2150_v3, %v2929_v8  ;;  %2191 = vmatprep.mubr.bf16.mxu0 %v944_v1  ;;  %v924_v14 = vmax.f32 %v858_v4, 0.0 }
 0x243   : > { %v860_v10 = vpop.f32.mrf.mxu1  ;;  %2192 = vmatmul.mubr.bf16.gmra.mxu0 %v945_v2 }
 0x244   : > { %v861_v9 = vadd.f32 %v2929_v8, %v860_v10  ;;  %v927_v11 = vmax.f32 %v869_v5, 0.0 }
 0x245   : > { %v2153_v12 = vpop.f32.mrf.mxu1 }
 0x246   : > { %v925_v15 = vmax.f32 %v861_v9, 0.0  ;;  %v947_v19 = vpack.c.bf16 %v927_v11, %v926_v16  ;;  %v882_v24 = vadd.f32 %v2153_v12, %v2929_v8 }
 0x247   : > { %v873_v17 = vpop.f32.mrf.mxu1 }
 0x248   : > { %v946_v18 = vpack.c.bf16 %v925_v15, %v924_v14  ;;  %v874_v21 = vadd.f32 %v2929_v8, %v873_v17  ;;  %v930_v32 = vmax.f32 %v882_v24, 0.0 }
 0x249   : > { %v2154_v20 = vpop.f32.mrf.mxu1 }
 0x24a   : > { %v885_v23 = vadd.f32 %v2154_v20, %v2929_v8  ;;  %2195 = vmatprep.mubr.bf16.mxu0 %v946_v18  ;;  %v928_v30 = vmax.f32 %v874_v21, 0.0 }
 0x24b   : > { %v876_v25 = vpop.f32.mrf.mxu1  ;;  %2196 = vmatmul.mubr.bf16.gmra.mxu0 %v947_v19 }
 0x24c   : > { %v877_v27 = vadd.f32 %v2929_v8, %v876_v25  ;;  %v931_v28 = vmax.f32 %v885_v23, 0.0 }
 0x24d   : > { %v2157_v29 = vpop.f32.mrf.mxu1 }
 0x24e   : > { %v929_v26 = vmax.f32 %v877_v27, 0.0  ;;  %v949_v13 = vpack.c.bf16 %v931_v28, %v930_v32  ;;  %v898_v37 = vadd.f32 %v2157_v29, %v2929_v8 }
 0x24f   : > { %v889_v33 = vpop.f32.mrf.mxu1 }
 0x250   : > { %v948_v6 = vpack.c.bf16 %v929_v26, %v928_v30  ;;  %v890_v35 = vadd.f32 %v2929_v8, %v889_v33  ;;  %v934_v43 = vmax.f32 %v898_v37, 0.0 }
 0x251   : > { %v2158_v34 = vpop.f32.mrf.mxu1 }
 0x252   : > { %v901_v36 = vadd.f32 %v2158_v34, %v2929_v8  ;;  %2199 = vmatprep.mubr.bf16.mxu0 %v948_v6  ;;  %v932_v41 = vmax.f32 %v890_v35, 0.0 }
 0x253   : > { %v892_v38 = vpop.f32.mrf.mxu1  ;;  %2200 = vmatmul.mubr.bf16.gmra.mxu0 %v949_v13 }
 0x254   : > { %v893_v39 = vadd.f32 %v2929_v8, %v892_v38  ;;  %v935_v40 = vmax.f32 %v901_v36, 0.0 }
 0x256   : > { %v933_v42 = vmax.f32 %v893_v39, 0.0  ;;  %v951_v44 = vpack.c.bf16 %v935_v40, %v934_v43 }
 0x258   : > { %v950_v22 = vpack.c.bf16 %v933_v42, %v932_v41 }
 0x25a   : > { %2203 = vmatprep.mubr.bf16.mxu0 %v950_v22 }
 0x25b   : > { %2204 = vmatmul.mubr.bf16.gmra.mxu0 %v951_v44 }
 0x2e3   : > { %v2177_v48 = vpop.f32.mrf.mxu0 }
 0x2e4   : > { %v1066_v8 = vadd.f32 %v2177_v48, %v2968_v47 }
 0x2e5   : > { %v1057_v49 = vpop.f32.mrf.mxu0 }
 0x2e6   : > { %v1058_v50 = vadd.f32 %v2968_v47, %v1057_v49  ;;  %v2975_v51 = vsel %vm1186_vm0, %v1066_v8, -1e+30 }
 0x2e7   : > { %1223 = vmax.xlane.f32.xlu1 %v2975_v51  ;;  %v2178_v52 = vpop.f32.mrf.mxu0 }
 0x2e8   : > { %v1069_v53 = vadd.f32 %v2178_v52, %v2968_v47  ;;  %v2981_v54 = vsel %vm1186_vm0, %v1058_v50, -1e+30 }
 0x2e9   : > { %v1060_v55 = vpop.f32.mrf.mxu0  ;;  %1219 = vmax.xlane.f32.xlu0 %v2981_v54 }
 0x2ea   : > { %v1061_v45 = vadd.f32 %v2968_v47, %v1060_v55  ;;  %v2987_v56 = vsel %vm1186_vm0, %v1069_v53, -1e+30 }
 0x2eb   : > { %1225 = vmax.xlane.f32.xlu1 %v2987_v56  ;;  %v2181_v57 = vpop.f32.mrf.mxu0 }
 0x2ec   : > { %v1082_v58 = vadd.f32 %v2181_v57, %v2968_v47  ;;  %v2993_v59 = vsel %vm1186_vm0, %v1061_v45, -1e+30 }
 0x2ed   : > { %v1073_v60 = vpop.f32.mrf.mxu0  ;;  %1221 = vmax.xlane.f32.xlu0 %v2993_v59 }
 0x2ee   : > { %v1074_v62 = vadd.f32 %v2968_v47, %v1073_v60  ;;  %v3000_v0 = vsel %vm1186_vm0, %v1082_v58, -1e+30 }
 0x2ef   : > { %v2182_v61 = vpop.f32.mrf.mxu0 }
 0x2f0   : > { %v1085_v63 = vadd.f32 %v2182_v61, %v2968_v47  ;;  %v3012_v7 = vsel %vm1186_vm0, %v1074_v62, -1e+30 }
 0x2f1   : > { %v1076_v1 = vpop.f32.mrf.mxu0  ;;  %1231 = vmax.xlane.f32.xlu0 %v3000_v0 }
 0x2f2   : > { %v1077_v2 = vadd.f32 %v2968_v47, %v1076_v1  ;;  %v3006_v3 = vsel %vm1186_vm0, %v1085_v63, -1e+30 }
 0x2f3   : > { %1233 = vmax.xlane.f32.xlu1 %v3006_v3  ;;  %v2185_v4 = vpop.f32.mrf.mxu0 }
 0x2f4   : > { %v1098_v5 = vadd.f32 %v2185_v4, %v2968_v47  ;;  %v3017_v9 = vsel %vm1186_vm0, %v1077_v2, -1e+30 }
 0x2f5   : > { %v1089_v10 = vpop.f32.mrf.mxu0  ;;  %1227 = vmax.xlane.f32.xlu0 %v3012_v7 }
 0x2f6   : > { %v1090_v12 = vadd.f32 %v2968_v47, %v1089_v10  ;;  %v3024_v15 = vsel %vm1186_vm0, %v1098_v5, -1e+30 }
 0x2f7   : > { %v2186_v11 = vpop.f32.mrf.mxu0  ;;  %1229 = vmax.xlane.f32.xlu1 %v3017_v9 }
 0x2f8   : > { %v1101_v14 = vadd.f32 %v2186_v11, %v2968_v47  ;;  %v3036_v21 = vsel %vm1186_vm0, %v1090_v12, -1e+30 }
 0x2f9   : > { %v1092_v16 = vpop.f32.mrf.mxu0  ;;  %1239 = vmax.xlane.f32.xlu0 %v3024_v15 }
 0x2fa   : > { %v1093_v17 = vadd.f32 %v2968_v47, %v1092_v16  ;;  %v3030_v18 = vsel %vm1186_vm0, %v1101_v14, -1e+30 }
 0x2fb   : > { %v2189_v19 = vpop.f32.mrf.mxu0  ;;  %1241 = vmax.xlane.f32.xlu1 %v3030_v18 }
 0x2fc   : > { %v1114_v20 = vadd.f32 %v2189_v19, %v2968_v47  ;;  %v3041_v24 = vsel %vm1186_vm0, %v1093_v17, -1e+30 }
 0x2fd   : > { %v1105_v23 = vpop.f32.mrf.mxu0  ;;  %1235 = vmax.xlane.f32.xlu0 %v3036_v21 }
 0x2fe   : > { %v1106_v27 = vadd.f32 %v2968_v47, %v1105_v23  ;;  %v3048_v29 = vsel %vm1186_vm0, %v1114_v20, -1e+30 }
 0x2ff   : > { %v2190_v25 = vpop.f32.mrf.mxu0  ;;  %1237 = vmax.xlane.f32.xlu1 %v3041_v24 }
 0x300   : > { %v1117_v28 = vadd.f32 %v2190_v25, %v2968_v47  ;;  %v3060_v13 = vsel %vm1186_vm0, %v1106_v27, -1e+30 }
 0x301   : > { %v1108_v30 = vpop.f32.mrf.mxu0  ;;  %1247 = vmax.xlane.f32.xlu0 %v3048_v29 }
 0x302   : > { %v1109_v26 = vadd.f32 %v2968_v47, %v1108_v30  ;;  %v3054_v32 = vsel %vm1186_vm0, %v1117_v28, -1e+30 }
 0x303   : > { %v2193_v33 = vpop.f32.mrf.mxu0  ;;  %1249 = vmax.xlane.f32.xlu1 %v3054_v32 }
 0x304   : > { %v1130_v6 = vadd.f32 %v2193_v33, %v2968_v47  ;;  %v3065_v35 = vsel %vm1186_vm0, %v1109_v26, -1e+30 }
 0x305   : > { %v1121_v34 = vpop.f32.mrf.mxu0  ;;  %1243 = vmax.xlane.f32.xlu0 %v3060_v13 }
 0x306   : > { %v1122_v37 = vadd.f32 %v2968_v47, %v1121_v34  ;;  %v3072_v39 = vsel %vm1186_vm0, %v1130_v6, -1e+30 }
 0x307   : > { %v2194_v36 = vpop.f32.mrf.mxu0  ;;  %1245 = vmax.xlane.f32.xlu1 %v3065_v35 }
 0x308   : > { %v1133_v38 = vadd.f32 %v2194_v36, %v2968_v47  ;;  %v3084_v44 = vsel %vm1186_vm0, %v1122_v37, -1e+30 }
 0x309   : > { %v1124_v40 = vpop.f32.mrf.mxu0  ;;  %1255 = vmax.xlane.f32.xlu0 %v3072_v39 }
 0x30a   : > { %v1125_v41 = vadd.f32 %v2968_v47, %v1124_v40  ;;  %v3078_v42 = vsel %vm1186_vm0, %v1133_v38, -1e+30 }
 0x30b   : > { %v2197_v43 = vpop.f32.mrf.mxu0  ;;  %1257 = vmax.xlane.f32.xlu1 %v3078_v42 }
 0x30c   : > { %v1146_v22 = vadd.f32 %v2197_v43, %v2968_v47  ;;  %v3089_v48 = vsel %vm1186_vm0, %v1125_v41, -1e+30 }
 0x30d   : > { %v1137_v31 = vpop.f32.mrf.mxu0  ;;  %1251 = vmax.xlane.f32.xlu0 %v3084_v44 }
 0x30e   : > { %v1138_v49 = vadd.f32 %v2968_v47, %v1137_v31  ;;  %v3096_v52 = vsel %vm1186_vm0, %v1146_v22, -1e+30 }
 0x30f   : > { %v2198_v8 = vpop.f32.mrf.mxu0  ;;  %1253 = vmax.xlane.f32.xlu1 %v3089_v48 }
 0x310   : > { %v1149_v50 = vadd.f32 %v2198_v8, %v2968_v47  ;;  %v3108_v60 = vsel %vm1186_vm0, %v1138_v49, -1e+30 }
 0x311   : > { %v1140_v53 = vpop.f32.mrf.mxu0  ;;  %1263 = vmax.xlane.f32.xlu0 %v3096_v52 }
 0x312   : > { %v1141_v55 = vadd.f32 %v2968_v47, %v1140_v53  ;;  %v3102_v45 = vsel %vm1186_vm0, %v1149_v50, -1e+30 }
 0x313   : > { %v2201_v57 = vpop.f32.mrf.mxu0  ;;  %1265 = vmax.xlane.f32.xlu1 %v3102_v45 }
 0x314   : > { %v1162_v58 = vadd.f32 %v2201_v57, %v2968_v47  ;;  %v3113_v62 = vsel %vm1186_vm0, %v1141_v55, -1e+30 }
 0x315   : > { %v1153_v61 = vpop.f32.mrf.mxu0  ;;  %1259 = vmax.xlane.f32.xlu0 %v3108_v60 }
 0x316   : > { %v1154_v1 = vadd.f32 %v2968_v47, %v1153_v61  ;;  %v3120_v4 = vsel %vm1186_vm0, %v1162_v58, -1e+30 }
 0x317   : > { %v2202_v63 = vpop.f32.mrf.mxu0  ;;  %1261 = vmax.xlane.f32.xlu1 %v3113_v62 }
 0x318   : > { %v1165_v2 = vadd.f32 %v2202_v63, %v2968_v47  ;;  %v3131_v14 = vsel %vm1186_vm0, %v1154_v1, -1e+30 }
 0x319   : > { %v1156_v5 = vpop.f32.mrf.mxu0  ;;  %1271 = vmax.xlane.f32.xlu0 %v3120_v4 }
 0x31a   : > { %v1157_v10 = vadd.f32 %v2968_v47, %v1156_v5  ;;  %v3126_v11 = vsel %vm1186_vm0, %v1165_v2, -1e+30 }
 0x31b   : > { %v2205_v12 = vpop.f32.mrf.mxu0  ;;  %1273 = vmax.xlane.f32.xlu1 %v3126_v11 }
 0x31c   : > { %v3137_v19 = vsel %vm1186_vm0, %v1157_v10, -1e+30  ;;  %v1178_v23 = vadd.f32 %v2205_v12, %v2968_v47 }
 0x31d   : > { %v1169_v16 = vpop.f32.mrf.mxu0  ;;  %1267 = vmax.xlane.f32.xlu0 %v3131_v14 }
 0x31e   : > { %v1170_v17 = vadd.f32 %v2968_v47, %v1169_v16  ;;  %v3158_v6 = vsel %vm1186_vm0, %v1178_v23, -1e+30 }
 0x31f   : > { %v2206_v20 = vpop.f32.mrf.mxu0  ;;  %1269 = vmax.xlane.f32.xlu1 %v3137_v19 }
 0x320   : > { %v1181_v25 = vadd.f32 %v2206_v20, %v2968_v47  ;;  %v3144_v27 = vsel %vm1186_vm0, %v1170_v17, -1e+30 }
 0x321   : > { %v1172_v28 = vpop.f32.mrf.mxu0  ;;  %1275 = vmax.xlane.f32.xlu0 %v3144_v27 }
 0x322   : > { %v1173_v30 = vadd.f32 %v2968_v47, %v1172_v28  ;;  %v3150_v26 = vsel %vm1186_vm0, %v1181_v25, -1e+30 }
 0x324   : > { %v3154_v33 = vsel %vm1186_vm0, %v1173_v30, -1e+30 }
 0x325   : > { %1277 = vmax.xlane.f32.xlu1 %v3154_v33  ;;  %1279 = vmax.xlane.f32.xlu0 %v3158_v6 }
 0x329   : > { %1281 = vmax.xlane.f32.xlu1 %v3150_v26 }
 0x370   : > { %v1224_v34 = vpop.xlane.xlu1 %1223 }
 0x371   : > { %v1285_v47 = vsub.f32 %v2975_v51, %v1224_v34 }
 0x372   : > { %v1220_v36 = vpop.xlane.xlu0 %1219 }
 0x373   : > { %v1319_v37 = vmul.f32 1.442695, %v1285_v47  ;;  %v1283_v38 = vsub.f32 %v2981_v54, %v1220_v36 }
 0x374   : > { %v1226_v40 = vpop.xlane.xlu1 %1225 }
 0x375   : > { %2330 = vpow2.f32 %v1319_v37  ;;  %v1315_v41 = vmul.f32 1.442695, %v1283_v38  ;;  %v1286_v46 = vsub.f32 %v2987_v56, %v1226_v40 }
 0x376   : > { %v1222_v43 = vpop.xlane.xlu0 %1221 }
 0x377   : > { %v1321_v22 = vmul.f32 1.442695, %v1286_v46  ;;  %v1284_v31 = vsub.f32 %v2993_v59, %v1222_v43  ;;  %2332 = vpow2.f32 %v1315_v41 }
 0x379   : > { %2334 = vpow2.f32 %v1321_v22  ;;  %v1317_v8 = vmul.f32 1.442695, %v1284_v31 }
 0x37a   : > { %v1232_v49 = vpop.xlane.xlu0 %1231 }
 0x37b   : > { %v1289_v50 = vsub.f32 %v3000_v0, %v1232_v49  ;;  %2336 = vpow2.f32 %v1317_v8 }
 0x37c   : > { %v1234_v51 = vpop.xlane.xlu1 %1233 }
 0x37d   : > { %v1327_v53 = vmul.f32 1.442695, %v1289_v50  ;;  %v1290_v54 = vsub.f32 %v3006_v3, %v1234_v51 }
 0x37e   : > { %v1228_v55 = vpop.xlane.xlu0 %1227 }
 0x37f   : > { %2338 = vpow2.f32 %v1327_v53  ;;  %v1329_v57 = vmul.f32 1.442695, %v1290_v54  ;;  %v1287_v56 = vsub.f32 %v3012_v7, %v1228_v55 }
 0x380   : > { %v1230_v58 = vpop.xlane.xlu1 %1229 }
 0x381   : > { %2340 = vpow2.f32 %v1329_v57  ;;  %v1323_v61 = vmul.f32 1.442695, %v1287_v56  ;;  %v1288_v59 = vsub.f32 %v3017_v9, %v1230_v58 }
 0x382   : > { %v3171_v63 = vpop.eup %2330  ;;  %v1240_v1 = vpop.xlane.xlu0 %1239 }
 0x383   : > { %2342 = vpow2.f32 %v1323_v61  ;;  %v1325_v0 = vmul.f32 1.442695, %v1288_v59  ;;  %v1293_v2 = vsub.f32 %v3024_v15, %v1240_v1  ;;  %1383 = vadd.xlane.f32.xlu0 %v3171_v63 }
 0x384   : > { %v1242_v3 = vpop.xlane.xlu1 %1241  ;;  %v3175_v5 = vpop.eup %2332 }
 0x385   : > { %2344 = vpow2.f32 %v1325_v0  ;;  %v1335_v10 = vmul.f32 1.442695, %v1293_v2  ;;  %v1294_v7 = vsub.f32 %v3030_v18, %v1242_v3 }
 0x386   : > { %v3178_v12 = vpop.eup %2334  ;;  %v1236_v16 = vpop.xlane.xlu0 %1235 }
 0x387   : > { %2346 = vpow2.f32 %v1335_v10  ;;  %v1337_v9 = vmul.f32 1.442695, %v1294_v7  ;;  %v1291_v17 = vsub.f32 %v3036_v21, %v1236_v16  ;;  %1385 = vadd.xlane.f32.xlu1 %v3178_v12  ;;  %1379 = vadd.xlane.f32.xlu0 %v3175_v5 }
 0x388   : > { %v1238_v15 = vpop.xlane.xlu1 %1237  ;;  %v3184_v25 = vpop.eup %2336 }
 0x389   : > { %2348 = vpow2.f32 %v1337_v9  ;;  %v1331_v20 = vmul.f32 1.442695, %v1291_v17  ;;  %v1292_v23 = vsub.f32 %v3041_v24, %v1238_v15 }
 0x38a   : > { %v1248_v28 = vpop.xlane.xlu0 %1247 }
 0x38b   : > { %2350 = vpow2.f32 %v1331_v20  ;;  %v1333_v18 = vmul.f32 1.442695, %v1292_v23  ;;  %v1297_v30 = vsub.f32 %v3048_v29, %v1248_v28  ;;  %1381 = vadd.xlane.f32.xlu1 %v3184_v25 }
 0x38c   : > { %v3188_v34 = vpop.eup %2338  ;;  %v1250_v21 = vpop.xlane.xlu1 %1249 }
 0x38d   : > { %2352 = vpow2.f32 %v1333_v18  ;;  %v1343_v47 = vmul.f32 1.442695, %v1297_v30  ;;  %v1298_v36 = vsub.f32 %v3054_v32, %v1250_v21  ;;  %1391 = vadd.xlane.f32.xlu0 %v3188_v34 }
 0x38e   : > { %v3192_v37 = vpop.eup %2340  ;;  %v1244_v24 = vpop.xlane.xlu0 %1243 }
 0x38f   : > { %2354 = vpow2.f32 %v1343_v47  ;;  %v1345_v38 = vmul.f32 1.442695, %v1298_v36  ;;  %v1295_v40 = vsub.f32 %v3060_v13, %v1244_v24  ;;  %1393 = vadd.xlane.f32.xlu1 %v3192_v37 }
 0x390   : > { %v3196_v29 = vpop.eup %2342  ;;  %v1246_v41 = vpop.xlane.xlu1 %1245 }
 0x391   : > { %2356 = vpow2.f32 %v1345_v38  ;;  %v1339_v46 = vmul.f32 1.442695, %v1295_v40  ;;  %v1296_v43 = vsub.f32 %v3065_v35, %v1246_v41  ;;  %1387 = vadd.xlane.f32.xlu0 %v3196_v29 }
 0x392   : > { %v3200_v32 = vpop.eup %2344  ;;  %v1256_v22 = vpop.xlane.xlu0 %1255 }
 0x393   : > { %2358 = vpow2.f32 %v1339_v46  ;;  %v1341_v31 = vmul.f32 1.442695, %v1296_v43  ;;  %v1301_v8 = vsub.f32 %v3072_v39, %v1256_v22  ;;  %1389 = vadd.xlane.f32.xlu1 %v3200_v32 }
 0x394   : > { %v3204_v13 = vpop.eup %2346  ;;  %v1258_v49 = vpop.xlane.xlu1 %1257 }
 0x395   : > { %2360 = vpow2.f32 %v1341_v31  ;;  %v1351_v50 = vmul.f32 1.442695, %v1301_v8  ;;  %v1302_v51 = vsub.f32 %v3078_v42, %v1258_v49  ;;  %1399 = vadd.xlane.f32.xlu0 %v3204_v13 }
 0x396   : > { %v3208_v35 = vpop.eup %2348  ;;  %v1252_v53 = vpop.xlane.xlu0 %1251 }
 0x397   : > { %2362 = vpow2.f32 %v1351_v50  ;;  %v1353_v54 = vmul.f32 1.442695, %v1302_v51  ;;  %v1299_v55 = vsub.f32 %v3084_v44, %v1252_v53  ;;  %1401 = vadd.xlane.f32.xlu1 %v3208_v35 }
 0x398   : > { %v3212_v39 = vpop.eup %2350  ;;  %v1254_v57 = vpop.xlane.xlu1 %1253 }
 0x399   : > { %2364 = vpow2.f32 %v1353_v54  ;;  %v1347_v56 = vmul.f32 1.442695, %v1299_v55  ;;  %v1300_v58 = vsub.f32 %v3089_v48, %v1254_v57  ;;  %1395 = vadd.xlane.f32.xlu0 %v3212_v39 }
 0x39a   : > { %v3216_v42 = vpop.eup %2352  ;;  %v1264_v61 = vpop.xlane.xlu0 %1263 }
 0x39b   : > { %2366 = vpow2.f32 %v1347_v56  ;;  %v1349_v59 = vmul.f32 1.442695, %v1300_v58  ;;  %v1305_v1 = vsub.f32 %v3096_v52, %v1264_v61  ;;  %1397 = vadd.xlane.f32.xlu1 %v3216_v42 }
 0x39c   : > { %v3220_v44 = vpop.eup %2354  ;;  %v1266_v0 = vpop.xlane.xlu1 %1265 }
 0x39d   : > { %2368 = vpow2.f32 %v1349_v59  ;;  %v1359_v2 = vmul.f32 1.442695, %v1305_v1  ;;  %v1306_v3 = vsub.f32 %v3102_v45, %v1266_v0  ;;  %1407 = vadd.xlane.f32.xlu0 %v3220_v44 }
 0x39e   : > { %v3224_v48 = vpop.eup %2356  ;;  %v1260_v10 = vpop.xlane.xlu0 %1259 }
 0x39f   : > { %2370 = vpow2.f32 %v1359_v2  ;;  %v1361_v7 = vmul.f32 1.442695, %v1306_v3  ;;  %v1303_v16 = vsub.f32 %v3108_v60, %v1260_v10  ;;  %1409 = vadd.xlane.f32.xlu1 %v3224_v48 }
 0x3a0   : > { %v3228_v52 = vpop.eup %2358  ;;  %v1262_v9 = vpop.xlane.xlu1 %1261 }
 0x3a1   : > { %2372 = vpow2.f32 %v1361_v7  ;;  %v1355_v17 = vmul.f32 1.442695, %v1303_v16  ;;  %v1304_v15 = vsub.f32 %v3113_v62, %v1262_v9  ;;  %1403 = vadd.xlane.f32.xlu0 %v3228_v52 }
 0x3a2   : > { %v3232_v45 = vpop.eup %2360  ;;  %v1272_v20 = vpop.xlane.xlu0 %1271 }
 0x3a3   : > { %2374 = vpow2.f32 %v1355_v17  ;;  %v1357_v23 = vmul.f32 1.442695, %v1304_v15  ;;  %v1309_v28 = vsub.f32 %v3120_v4, %v1272_v20  ;;  %1405 = vadd.xlane.f32.xlu1 %v3232_v45 }
 0x3a4   : > { %v3236_v60 = vpop.eup %2362  ;;  %v1274_v18 = vpop.xlane.xlu1 %1273 }
 0x3a5   : > { %2376 = vpow2.f32 %v1357_v23  ;;  %v1367_v30 = vmul.f32 1.442695, %v1309_v28  ;;  %v1310_v21 = vsub.f32 %v3126_v11, %v1274_v18  ;;  %1415 = vadd.xlane.f32.xlu0 %v3236_v60 }
 0x3a6   : > { %v3240_v62 = vpop.eup %2364  ;;  %v1268_v47 = vpop.xlane.xlu0 %1267 }
 0x3a7   : > { %2378 = vpow2.f32 %v1367_v30  ;;  %v1369_v36 = vmul.f32 1.442695, %v1310_v21  ;;  %v1307_v24 = vsub.f32 %v3131_v14, %v1268_v47  ;;  %1417 = vadd.xlane.f32.xlu1 %v3240_v62 }
 0x3a8   : > { %v3244_v4 = vpop.eup %2366  ;;  %v1270_v38 = vpop.xlane.xlu1 %1269 }
 0x3a9   : > { %2380 = vpow2.f32 %v1369_v36  ;;  %v1363_v40 = vmul.f32 1.442695, %v1307_v24  ;;  %v1308_v41 = vsub.f32 %v3137_v19, %v1270_v38  ;;  %1411 = vadd.xlane.f32.xlu0 %v3244_v4 }
 0x3aa   : > { %v3248_v11 = vpop.eup %2368  ;;  %v1276_v46 = vpop.xlane.xlu0 %1275 }
 0x3ab   : > { %2382 = vpow2.f32 %v1363_v40  ;;  %v1365_v43 = vmul.f32 1.442695, %v1308_v41  ;;  %v1311_v22 = vsub.f32 %v3144_v27, %v1276_v46  ;;  %1413 = vadd.xlane.f32.xlu1 %v3248_v11 }
 0x3ac   : > { %v3252_v14 = vpop.eup %2370 }
 0x3ad   : > { %2384 = vpow2.f32 %v1365_v43  ;;  %v1371_v31 = vmul.f32 1.442695, %v1311_v22  ;;  %1423 = vadd.xlane.f32.xlu0 %v3252_v14 }
 0x3ae   : > { %v3255_v8 = vpop.eup %2372  ;;  %v1278_v19 = vpop.xlane.xlu1 %1277 }
 0x3af   : > { %v1280_v49 = vpop.xlane.xlu0 %1279  ;;  %2386 = vpow2.f32 %v1371_v31  ;;  %v1312_v50 = vsub.f32 %v3154_v33, %v1278_v19  ;;  %1425 = vadd.xlane.f32.xlu1 %v3255_v8 }
 0x3b0   : > { %v1313_v51 = vsub.f32 %v3158_v6, %v1280_v49  ;;  %v3260_v27 = vpop.eup %2374 }
 0x3b1   : > { %v1373_v53 = vmul.f32 1.442695, %v1312_v50  ;;  %1419 = vadd.xlane.f32.xlu0 %v3260_v27 }
 0x3b2   : > { %v1375_v54 = vmul.f32 1.442695, %v1313_v51  ;;  %v3263_v55 = vpop.eup %2376  ;;  %v1282_v57 = vpop.xlane.xlu1 %1281 }
 0x3b3   : > { %2388 = vpow2.f32 %v1373_v53  ;;  %v1314_v56 = vsub.f32 %v3150_v26, %v1282_v57  ;;  %1421 = vadd.xlane.f32.xlu1 %v3263_v55 }
 0x3b4   : > { %v3267_v58 = vpop.eup %2378  ;;  %2390 = vpow2.f32 %v1375_v54 }
 0x3b5   : > { %v1377_v33 = vmul.f32 1.442695, %v1314_v56  ;;  %1431 = vadd.xlane.f32.xlu0 %v3267_v58 }
 0x3b6   : > { %v3270_v6 = vpop.eup %2380 }
 0x3b7   : > { %2392 = vpow2.f32 %v1377_v33  ;;  %1433 = vadd.xlane.f32.xlu1 %v3270_v6 }
 0x3b8   : > { %v3273_v61 = vpop.eup %2382 }
 0x3b9   : > { %1427 = vadd.xlane.f32.xlu0 %v3273_v61 }
 0x3ba   : > { %v3276_v59 = vpop.eup %2384 }
 0x3bb   : > { %1429 = vadd.xlane.f32.xlu1 %v3276_v59 }
 0x3bc   : > { %v3279_v26 = vpop.eup %2386 }
 0x3bd   : > { %1435 = vadd.xlane.f32.xlu0 %v3279_v26 }
 0x3c0   : > { %v3282_v1 = vpop.eup %2388 }
 0x3c1   : > { %v3284_v0 = vpop.eup %2390  ;;  %1437 = vadd.xlane.f32.xlu1 %v3282_v1 }
 0x3c2   : > { %1439 = vadd.xlane.f32.xlu0 %v3284_v0 }
 0x3c4   : > { %v3288_v2 = vpop.eup %2392 }
 0x3c5   : > { %1441 = vadd.xlane.f32.xlu1 %v3288_v2 }
 0x40c   : > { %v1384_v3 = vpop.xlane.xlu0 %1383 }
 0x40d   : > { %2394 = vrcp.f32 %v1384_v3 }
 0x410   : > { %v1386_v10 = vpop.xlane.xlu1 %1385  ;;  %v1380_v7 = vpop.xlane.xlu0 %1379 }
 0x411   : > { %2396 = vrcp.f32 %v1386_v10 }
 0x412   : > { %2398 = vrcp.f32 %v1380_v7 }
 0x414   : > { %v1382_v16 = vpop.xlane.xlu1 %1381 }
 0x415   : > { %2400 = vrcp.f32 %v1382_v16 }
 0x416   : > { %v1392_v9 = vpop.xlane.xlu0 %1391 }
 0x417   : > { %2402 = vrcp.f32 %v1392_v9 }
 0x418   : > { %v1394_v17 = vpop.xlane.xlu1 %1393 }
 0x419   : > { %2404 = vrcp.f32 %v1394_v17 }
 0x41a   : > { %v1388_v15 = vpop.xlane.xlu0 %1387  ;;  %v2395_v20 = vpop.eup %2394 }
 0x41b   : > { %2406 = vrcp.f32 %v1388_v15  ;;  %v1448_v30 = vmul.f32 %v2395_v20, %v3171_v63 }
 0x41c   : > { %v1390_v23 = vpop.xlane.xlu1 %1389 }
 0x41d   : > { %2408 = vrcp.f32 %v1390_v23 }
 0x41e   : > { %v2397_v28 = vpop.eup %2396  ;;  %v1400_v18 = vpop.xlane.xlu0 %1399 }
 0x41f   : > { %v1450_v21 = vmul.f32 %v2397_v28, %v3178_v12  ;;  %2410 = vrcp.f32 %v1400_v18  ;;  %v2399_v47 = vpop.eup %2398 }
 0x420   : > { %v1402_v36 = vpop.xlane.xlu1 %1401  ;;  %v1444_v41 = vmul.f32 %v2399_v47, %v3175_v5 }
 0x421   : > { %v1904_v24 = vpack.c.bf16 %v1450_v21, %v1448_v30  ;;  %2412 = vrcp.f32 %v1402_v36 }
 0x422   : > { %v2401_v38 = vpop.eup %2400  ;;  %v1396_v40 = vpop.xlane.xlu0 %1395 }
 0x423   : > { %1976 = vst [vmem:[%s3294_s29 + $0x8] sm:$0xff] %v1904_v24   ;;  %v1446_v46 = vmul.f32 %v2401_v38, %v3184_v25  ;;  %2414 = vrcp.f32 %v1396_v40 }
 0x424   : > { %v2403_v63 = vpop.eup %2402  ;;  %v1398_v12 = vpop.xlane.xlu1 %1397 }
 0x425   : > { %v1899_v43 = vpack.c.bf16 %v1446_v46, %v1444_v41  ;;  %2416 = vrcp.f32 %v1398_v12  ;;  %v1456_v19 = vmul.f32 %v2403_v63, %v3188_v34 }
 0x426   : > { %v2405_v22 = vpop.eup %2404  ;;  %v1408_v31 = vpop.xlane.xlu0 %1407 }
 0x427   : > { %1900 = vst [vmem:[%s3294_s29] sm:$0xff] %v1899_v43   ;;  %v1458_v49 = vmul.f32 %v2405_v22, %v3192_v37  ;;  %2418 = vrcp.f32 %v1408_v31 }
 0x428   : > { %v2407_v50 = vpop.eup %2406  ;;  %v1410_v51 = vpop.xlane.xlu1 %1409 }
 0x429   : > { %v1914_v5 = vpack.c.bf16 %v1458_v49, %v1456_v19  ;;  %2420 = vrcp.f32 %v1410_v51  ;;  %v1452_v54 = vmul.f32 %v2407_v50, %v3196_v29 }
 0x42a   : > { %v2409_v25 = vpop.eup %2408  ;;  %v1404_v53 = vpop.xlane.xlu0 %1403 }
 0x42b   : > { %1978 = vst [vmem:[%s3294_s29 + $0x18] sm:$0xff] %v1914_v5   ;;  %v1454_v57 = vmul.f32 %v2409_v25, %v3200_v32  ;;  %2422 = vrcp.f32 %v1404_v53 }
 0x42c   : > { %v2411_v56 = vpop.eup %2410  ;;  %v1406_v33 = vpop.xlane.xlu1 %1405 }
 0x42d   : > { %v1909_v34 = vpack.c.bf16 %v1454_v57, %v1452_v54  ;;  %2424 = vrcp.f32 %v1406_v33  ;;  %v1464_v10 = vmul.f32 %v2411_v56, %v3204_v13 }
 0x42e   : > { %v2413_v37 = vpop.eup %2412  ;;  %v1416_v3 = vpop.xlane.xlu0 %1415 }
 0x42f   : > { %1977 = vst [vmem:[%s3294_s29 + $0x10] sm:$0xff] %v1909_v34   ;;  %v1466_v7 = vmul.f32 %v2413_v37, %v3208_v35  ;;  %2426 = vrcp.f32 %v1416_v3 }
 0x430   : > { %v2415_v16 = vpop.eup %2414  ;;  %v1418_v9 = vpop.xlane.xlu1 %1417 }
 0x431   : > { %v1924_v29 = vpack.c.bf16 %v1466_v7, %v1464_v10  ;;  %2428 = vrcp.f32 %v1418_v9  ;;  %v1460_v15 = vmul.f32 %v2415_v16, %v3212_v39 }
 0x432   : > { %v2417_v32 = vpop.eup %2416  ;;  %v1412_v17 = vpop.xlane.xlu0 %1411 }
 0x433   : > { %1980 = vst [vmem:[%s3294_s29 + $0x28] sm:$0xff] %v1924_v29   ;;  %v1462_v20 = vmul.f32 %v2417_v32, %v3216_v42  ;;  %2430 = vrcp.f32 %v1412_v17 }
 0x434   : > { %v2419_v23 = vpop.eup %2418  ;;  %v1414_v28 = vpop.xlane.xlu1 %1413 }
 0x435   : > { %v1919_v13 = vpack.c.bf16 %v1462_v20, %v1460_v15  ;;  %2432 = vrcp.f32 %v1414_v28  ;;  %v1472_v30 = vmul.f32 %v2419_v23, %v3220_v44 }
 0x436   : > { %v2421_v35 = vpop.eup %2420  ;;  %v1424_v18 = vpop.xlane.xlu0 %1423 }
 0x437   : > { %1979 = vst [vmem:[%s3294_s29 + $0x20] sm:$0xff] %v1919_v13   ;;  %v1474_v21 = vmul.f32 %v2421_v35, %v3224_v48  ;;  %2434 = vrcp.f32 %v1424_v18 }
 0x438   : > { %v2423_v47 = vpop.eup %2422  ;;  %v1426_v36 = vpop.xlane.xlu1 %1425 }
 0x439   : > { %v1934_v39 = vpack.c.bf16 %v1474_v21, %v1472_v30  ;;  %2436 = vrcp.f32 %v1426_v36  ;;  %v1468_v38 = vmul.f32 %v2423_v47, %v3228_v52 }
 0x43a   : > { %v2425_v42 = vpop.eup %2424  ;;  %v1420_v24 = vpop.xlane.xlu0 %1419 }
 0x43b   : > { %1982 = vst [vmem:[%s3294_s29 + $0x38] sm:$0xff] %v1934_v39   ;;  %v1470_v40 = vmul.f32 %v2425_v42, %v3232_v45  ;;  %2438 = vrcp.f32 %v1420_v24 }
 0x43c   : > { %v2427_v41 = vpop.eup %2426  ;;  %v1422_v46 = vpop.xlane.xlu1 %1421 }
 0x43d   : > { %v1929_v44 = vpack.c.bf16 %v1470_v40, %v1468_v38  ;;  %2440 = vrcp.f32 %v1422_v46  ;;  %v1480_v12 = vmul.f32 %v2427_v41, %v3236_v60 }
 0x43e   : > { %v2429_v48 = vpop.eup %2428  ;;  %v1432_v63 = vpop.xlane.xlu0 %1431 }
 0x43f   : > { %1981 = vst [vmem:[%s3294_s29 + $0x30] sm:$0xff] %v1929_v44   ;;  %v1482_v43 = vmul.f32 %v2429_v48, %v3240_v62  ;;  %2442 = vrcp.f32 %v1432_v63 }
 0x440   : > { %v2431_v22 = vpop.eup %2430  ;;  %v1434_v31 = vpop.xlane.xlu1 %1433 }
 0x441   : > { %v1944_v52 = vpack.c.bf16 %v1482_v43, %v1480_v12  ;;  %2444 = vrcp.f32 %v1434_v31  ;;  %v1476_v49 = vmul.f32 %v2431_v22, %v3244_v4 }
 0x442   : > { %v2433_v45 = vpop.eup %2432  ;;  %v1428_v19 = vpop.xlane.xlu0 %1427 }
 0x443   : > { %1984 = vst [vmem:[%s3294_s29 + $0x48] sm:$0xff] %v1944_v52   ;;  %v1478_v50 = vmul.f32 %v2433_v45, %v3248_v11  ;;  %2446 = vrcp.f32 %v1428_v19 }
 0x444   : > { %v2435_v51 = vpop.eup %2434  ;;  %v1430_v5 = vpop.xlane.xlu1 %1429 }
 0x445   : > { %v1939_v60 = vpack.c.bf16 %v1478_v50, %v1476_v49  ;;  %2448 = vrcp.f32 %v1430_v5  ;;  %v1488_v53 = vmul.f32 %v2435_v51, %v3252_v14 }
 0x446   : > { %v2437_v62 = vpop.eup %2436  ;;  %v1436_v25 = vpop.xlane.xlu0 %1435 }
 0x447   : > { %1983 = vst [vmem:[%s3294_s29 + $0x40] sm:$0xff] %v1939_v60   ;;  %v1490_v54 = vmul.f32 %v2437_v62, %v3255_v8  ;;  %2450 = vrcp.f32 %v1436_v25 }
 0x448   : > { %v2439_v57 = vpop.eup %2438 }
 0x449   : > { %v1954_v56 = vpack.c.bf16 %v1490_v54, %v1488_v53  ;;  %v1484_v11 = vmul.f32 %v2439_v57, %v3260_v27 }
 0x44a   : > { %v2441_v4 = vpop.eup %2440  ;;  %v1438_v33 = vpop.xlane.xlu1 %1437 }
 0x44b   : > { %1986 = vst [vmem:[%s3294_s29 + $0x58] sm:$0xff] %v1954_v56   ;;  %v1486_v34 = vmul.f32 %v2441_v4, %v3263_v55  ;;  %2452 = vrcp.f32 %v1438_v33  ;;  %v1440_v37 = vpop.xlane.xlu0 %1439 }
 0x44c   : > { %v2443_v3 = vpop.eup %2442  ;;  %2454 = vrcp.f32 %v1440_v37 }
 0x44d   : > { %v1949_v10 = vpack.c.bf16 %v1486_v34, %v1484_v11  ;;  %v1496_v7 = vmul.f32 %v2443_v3, %v3267_v58 }
 0x44e   : > { %v2445_v14 = vpop.eup %2444  ;;  %v1442_v8 = vpop.xlane.xlu1 %1441 }
 0x44f   : > { %1985 = vst [vmem:[%s3294_s29 + $0x50] sm:$0xff] %v1949_v10   ;;  %v1498_v16 = vmul.f32 %v2445_v14, %v3270_v6  ;;  %2456 = vrcp.f32 %v1442_v8 }
 0x450   : > { %v2447_v27 = vpop.eup %2446 }
 0x451   : > { %v1964_v9 = vpack.c.bf16 %v1498_v16, %v1496_v7  ;;  %v1492_v29 = vmul.f32 %v2447_v27, %v3273_v61 }
 0x452   : > { %v2449_v55 = vpop.eup %2448 }
 0x453   : > { %1988 = vst [vmem:[%s3294_s29 + $0x68] sm:$0xff] %v1964_v9   ;;  %v1494_v32 = vmul.f32 %v2449_v55, %v3276_v59 }
 0x454   : > { %v2451_v15 = vpop.eup %2450 }
 0x455   : > { %v1959_v17 = vpack.c.bf16 %v1494_v32, %v1492_v29  ;;  %v1500_v6 = vmul.f32 %v2451_v15, %v3279_v26 }
 0x457   : > { %1987 = vst [vmem:[%s3294_s29 + $0x60] sm:$0xff] %v1959_v17  }
 0x458   : > { %v2453_v58 = vpop.eup %2452 }
 0x459   : > { %v1502_v20 = vmul.f32 %v2453_v58, %v3282_v1  ;;  %v2455_v23 = vpop.eup %2454 }
 0x45a   : > { %v1504_v61 = vmul.f32 %v2455_v23, %v3284_v0 }
 0x45b   : > { %v1969_v28 = vpack.c.bf16 %v1502_v20, %v1500_v6 }
 0x45c   : > { %v2457_v13 = vpop.eup %2456 }
 0x45d   : > { %1989 = vst [vmem:[%s3294_s29 + $0x70] sm:$0xff] %v1969_v28   ;;  %v1506_v59 = vmul.f32 %v2457_v13, %v3288_v2 }
 0x45f   : > { %v1974_v26 = vpack.c.bf16 %v1506_v59, %v1504_v61 }
 0x461   : > { %1990 = vst [vmem:[%s3294_s29 + $0x78] sm:$0xff] %v1974_v26  }
 0x462   : > { %2577 = shalt.err (!%p2574_p9)
}
 0x463   : > { %s2578_s10 = scalar_lea.hbm %s3346_s18, 2048  ;;  %s2582_s21 = scalar_lea.hbm %s3399_s7, 4096 }
 0x464   : > { %p2579_p1 = scmp.ne.s32.totalorder %s3346_s18, %s2578_s10  ;;  %p2583_p11 = scmp.lt.s32.totalorder %s3346_s18, %s3399_s7 }
 0x465   : > { %p2584_p13 = scmp.lt.s32.totalorder %s2582_s21, %s2578_s10 }
 0x466   : > { %p2580_p8 = pnand %p2579_p1, %p3419_p6 }
 0x467   : > { %p2585_p2 = por %p2584_p13, %p2583_p11 }
 0x468   : > { %p2581_p10 = pneg %p2580_p8 }
 0x46a   : > { %p2586_p4 = pnand %p2585_p2, %p2581_p10 }
 0x46c   : > { %2589 = shalt.err (!%p2586_p4)
}
 0x46d   : > { %s2647_s22 = smov 64   ;;  %s2648_s1 = smov 4  }
 0x46e   : > { %2237 = dma.vmem_to_hbm [thread:$0]  (%p3419_p6), %s3348_s15, 2048, %s3346_s18, %s1668_s28, %s2647_s22, %s2647_s22, %s2648_s1  }
 0x46f PF: > { %s1696_s19 = sand.u32 1, %s2624_s24   ;;  %p3420_p12 = scmp.ne.s32.totalorder %s3406_s8, 0 }
 0x470   : > { %p3421_p0 = scmp.ge.s32.totalorder %s2636_s27, 2  ;;  %s1697_s30 = scalar_lea.sflag [#allocation4], %s1696_s19 }
 0x472   : > { %p2254_p5 = pnand %p3421_p0, %p3420_p12 }
 0x474   : > { %p2255_p3 = pneg %p2254_p5 }
 0x476   : > { %2619 = dma.done.wait (%p2255_p3), %s1697_s30, 2048  }
 0x477   : > { %2621 = vsyncadd (%p2255_p3), %s1697_s30, 4294965248  ;;  %p22_p7 = scmp.ge.s32.totalorder %s2769_s14, 4   ;;  %s3422_s24 = smov %s2628_s25 }
 0x478   : > { %s3423_s25 = smov %s2632_s26  ;;  %s3424_s26 = smov %s2779_s17 }
 0x479   : > { %s3425_s27 = smov %s2769_s14  ;;  %24 = sbr.rel (!%p22_p7) target bundleno = 9 (0x9), region = 105 }
 0x47e   :  { %1702 = vsyncpa [#allocation3], 1 }
 0x47f   :  { %1704 = vsyncpa [#allocation3 + $0x1], 1 }
 0x480   :  { %1705 = vsyncpa [#allocation6], 1 }
 0x481   :  { %1706 = vsyncpa [#allocation9], 1 }
 0x482   :  { %1707 = vsyncpa [#allocation4], 1 }
 0x483   :  { %1709 = vsyncpa [#allocation4 + $0x1], 1 }

</bundles_post_ra>
